<compile_context>
chip_gen: v6e
topology: v6e:2x2x1
jax: 0.10.0
libtpu: 0.0.40
codegen_flags: <defaults>
</compile_context>

<pallas_src>
import jax
import jax.numpy as jnp
from jax import lax
from jax.experimental import pallas as pl
from jax.experimental.pallas import tpu as pltpu


def _lstm_linear_kernel(emb_ref, len_ref,
                        wih0_ref, whh0_ref, b0_ref,
                        w1s_ref, b1_ref,
                        wlin_ref, blin_ref,
                        out_ref):
    B = len_ref.shape[0]
    S = emb_ref.shape[0] // B
    H = whh0_ref.shape[0]

    # Hoist all weight / bias loads and broadcasts out of the recurrence.
    whh0 = whh0_ref[...]                                   # (H, 4H)
    w1s = w1s_ref[...]                                     # (2H, 4H) = [w_ih1_T; w_hh1_T]
    b1 = jnp.broadcast_to(b1_ref[...], (B, 4 * H))         # hoisted broadcast
    lens = len_ref[...]                                    # (B, 1) int32

    # Layer-0 input projection for all timesteps at once (bias folded in):
    # (S*B, E) @ (E, 4H) + b0  ->  (S*B, 4H)
    pre0 = (jnp.dot(emb_ref[...], wih0_ref[...],
                    preferred_element_type=jnp.float32) + b0_ref[...])

    def gates_to_hc(gates, c):
        # PyTorch gate order i, f, g, o.  Whole-vreg EUP pushes, then slice.
        sg = jax.nn.sigmoid(gates)
        th = jnp.tanh(gates)
        i = sg[:, 0 * H:1 * H]
        f = sg[:, 1 * H:2 * H]
        g = th[:, 2 * H:3 * H]
        o = sg[:, 3 * H:4 * H]
        c_new = f * c + i * g
        h_new = o * jnp.tanh(c_new)
        return h_new, c_new

    z = jnp.zeros((B, H), jnp.float32)
    h0, c0, h1, c1 = z, z, z, z

    # Fully unrolled recurrence (S is static and small); all slices are static.
    for t in range(S):
        live = lens > t                                    # (B, 1) bool
        g0 = pre0[t * B:(t + 1) * B, :] + jnp.dot(
            h0, whh0, preferred_element_type=jnp.float32)
        h0n, c0n = gates_to_hc(g0, c0)
        x1 = jnp.concatenate([h0n, h1], axis=-1)           # (B, 2H)
        g1 = jnp.dot(x1, w1s, preferred_element_type=jnp.float32) + b1
        h1n, c1n = gates_to_hc(g1, c1)
        # pack_padded_sequence semantics: freeze (h, c) once t >= x_len[b].
        h0 = jnp.where(live, h0n, h0)
        c0 = jnp.where(live, c0n, c0)
        h1 = jnp.where(live, h1n, h1)
        c1 = jnp.where(live, c1n, c1)

    # h_n: (n_layers, B, H) -> transpose(0,1) -> view(B, n_layers*H)
    # => concatenation order is [layer0 | layer1] along features.
    h_cat = jnp.concatenate([h0, h1], axis=-1)             # (B, 2H)
    out_ref[...] = (jnp.dot(h_cat, wlin_ref[...],
                            preferred_element_type=jnp.float32)
                    + blin_ref[...])


def lstm_model_forward(params, ids, lengths):
    """ids: (seq_len, batch) int32 token ids; lengths: (batch,) int32."""
    S, B = ids.shape
    B_pad = -(-B // 8) * 8                                 # pad batch to 8 sublanes

    # Embedding lookup (glue, plain JAX gather) + batch padding.
    emb = jnp.take(params["embedding"], ids, axis=0).astype(jnp.float32)  # (S,B,E)
    lens = lengths.astype(jnp.int32)
    if B_pad != B:
        emb = jnp.pad(emb, ((0, 0), (0, B_pad - B), (0, 0)))
        lens = jnp.pad(lens, (0, B_pad - B))               # padded rows: length 0
    E = emb.shape[-1]
    emb2d = emb.reshape(S * B_pad, E)                      # (S*B, E)
    len_col = lens.reshape(B_pad, 1)                       # (B, 1) int32

    out_dim = params["b_lin"].shape[-1]
    vmem = pl.BlockSpec(memory_space=pltpu.MemorySpace.VMEM)
    kernel = pl.pallas_call(
        _lstm_linear_kernel,
        out_shape=jax.ShapeDtypeStruct((B_pad, out_dim), jnp.float32),
        in_specs=[vmem] * 9,
        out_specs=vmem,
    )
    out = kernel(emb2d, len_col,
                 params["w_ih0_T"], params["w_hh0_T"], params["b0"],
                 params["w1_stacked"], params["b1"],
                 params["w_lin_T"], params["b_lin"])
    return out[:B]


def reference_forward(params, ids, lengths):
    """Pure-JAX reference (same math, lax.scan) for validation."""
    emb = jnp.take(params["embedding"], ids, axis=0).astype(jnp.float32)
    S, B = ids.shape
    H = params["w_hh0_T"].shape[0]
    mask = (jnp.arange(S)[:, None] < lengths[None, :]).astype(jnp.float32)[:, :, None]

    def cell(x, h, c, wT, uT, b):
        gates = x @ wT + h @ uT + b
        i, f, g, o = jnp.split(gates, 4, axis=-1)
        c = jax.nn.sigmoid(f) * c + jax.nn.sigmoid(i) * jnp.tanh(g)
        h = jax.nn.sigmoid(o) * jnp.tanh(c)
        return h, c

    def step(carry, xm):
        x, m = xm
        h0, c0, h1, c1 = carry
        h0n, c0n = cell(x, h0, c0, params["w_ih0_T"], params["w_hh0_T"], params["b0"])
        h1n, c1n = cell(h0n, h1, c1, params["w_ih1_T"], params["w_hh1_T"], params["b1"])
        h0 = m * h0n + (1 - m) * h0
        c0 = m * c0n + (1 - m) * c0
        h1 = m * h1n + (1 - m) * h1
        c1 = m * c1n + (1 - m) * c1
        return (h0, c0, h1, c1), None

    z = jnp.zeros((B, H), jnp.float32)
    (h0, c0, h1, c1), _ = lax.scan(step, (z, z, z, z), (emb, mask))
    h_cat = jnp.concatenate([h0, h1], axis=-1)
    return h_cat @ params["w_lin_T"] + params["b_lin"]


def init_params(key, vocab_size, embed_dim, hidden_dim, output_dim, pad_idx=0):
    ks = jax.random.split(key, 11)
    emb = jax.random.normal(ks[0], (vocab_size, embed_dim), jnp.float32)
    emb = emb.at[pad_idx].set(0.0)          # padding_idx row is zero
    bound = 1.0 / float(hidden_dim) ** 0.5

    def u(k, shape):
        return jax.random.uniform(k, shape, jnp.float32, -bound, bound)

    w_ih0 = u(ks[1], (4 * hidden_dim, embed_dim))
    w_hh0 = u(ks[2], (4 * hidden_dim, hidden_dim))
    b_ih0 = u(ks[3], (4 * hidden_dim,))
    b_hh0 = u(ks[4], (4 * hidden_dim,))
    w_ih1 = u(ks[5], (4 * hidden_dim, hidden_dim))
    w_hh1 = u(ks[6], (4 * hidden_dim, hidden_dim))
    b_ih1 = u(ks[7], (4 * hidden_dim,))
    b_hh1 = u(ks[8], (4 * hidden_dim,))
    w_lin = u(ks[9], (output_dim, 2 * hidden_dim))
    b_lin = u(ks[10], (output_dim,))

    return {
        "embedding": emb,
        "w_ih0_T": w_ih0.T, "w_hh0_T": w_hh0.T, "b0": (b_ih0 + b_hh0)[None, :],
        "w_ih1_T": w_ih1.T, "w_hh1_T": w_hh1.T, "b1": (b_ih1 + b_hh1)[None, :],
        # Fused layer-1 weight: gates1 = [x1 | h1] @ [w_ih1_T ; w_hh1_T]
        "w1_stacked": jnp.concatenate([w_ih1.T, w_hh1.T], axis=0),
        "w_lin_T": w_lin.T, "b_lin": b_lin[None, :],
    }


if __name__ == "__main__":
    vocab_size = 50
    embed_dim = 32
    hidden_dim = 32
    output_dim = 4
    seq_len = 8
    batch = 4
    pad_idx = 0

    key = jax.random.PRNGKey(0)
    k_params, k_ids = jax.random.split(key)
    params = init_params(k_params, vocab_size, embed_dim, hidden_dim,
                         output_dim, pad_idx=pad_idx)

    # Sorted-descending lengths (pack_padded_sequence requirement).
    lengths = jnp.array([8, 6, 5, 3], dtype=jnp.int32)
    ids = jax.random.randint(k_ids, (seq_len, batch), 1, vocab_size, dtype=jnp.int32)
    pad_mask = jnp.arange(seq_len)[:, None] >= lengths[None, :]
    ids = jnp.where(pad_mask, pad_idx, ids)

    logits = lstm_model_forward(params, ids, lengths)
    logits = jax.block_until_ready(logits)

    ref = jax.block_until_ready(reference_forward(params, ids, lengths))
    assert logits.shape == (batch, output_dim)
    assert jnp.allclose(logits, ref, atol=1e-5, rtol=1e-5), (logits, ref)

    print("KERNEL_OK")
</pallas_src>

<mosaic_0001>
module attributes {stable_mosaic.version = 11 : i64} {
  func.func @_lstm_linear_kernel(%arg0: memref<64x32xf32, #tpu.memory_space<vmem>>, %arg1: memref<8x1xi32, #tpu.memory_space<vmem>>, %arg2: memref<32x128xf32, #tpu.memory_space<vmem>>, %arg3: memref<32x128xf32, #tpu.memory_space<vmem>>, %arg4: memref<1x128xf32, #tpu.memory_space<vmem>>, %arg5: memref<64x128xf32, #tpu.memory_space<vmem>>, %arg6: memref<1x128xf32, #tpu.memory_space<vmem>>, %arg7: memref<64x4xf32, #tpu.memory_space<vmem>>, %arg8: memref<1x4xf32, #tpu.memory_space<vmem>>, %arg9: memref<8x4xf32, #tpu.memory_space<vmem>>) attributes {dimension_semantics = [], scalar_prefetch = 0 : i64, scratch_operands = 0 : i64, tpu.core_type = #tpu.core_type<tc>} {
    %c0 = arith.constant 0 : index
    %c0_0 = arith.constant 0 : index
    %0 = vector.load %arg3[%c0, %c0_0] : memref<32x128xf32, #tpu.memory_space<vmem>>, vector<32x128xf32>
    %c0_1 = arith.constant 0 : index
    %c0_2 = arith.constant 0 : index
    %1 = vector.load %arg5[%c0_1, %c0_2] : memref<64x128xf32, #tpu.memory_space<vmem>>, vector<64x128xf32>
    %c0_3 = arith.constant 0 : index
    %c0_4 = arith.constant 0 : index
    %2 = vector.load %arg6[%c0_3, %c0_4] : memref<1x128xf32, #tpu.memory_space<vmem>>, vector<1x128xf32>
    %3 = vector.shape_cast %2 : vector<1x128xf32> to vector<1x128xf32>
    %4 = vector.broadcast %3 : vector<1x128xf32> to vector<8x128xf32>
    %c0_5 = arith.constant 0 : index
    %c0_6 = arith.constant 0 : index
    %5 = vector.load %arg1[%c0_5, %c0_6] : memref<8x1xi32, #tpu.memory_space<vmem>>, vector<8x1xi32>
    %c0_7 = arith.constant 0 : index
    %c0_8 = arith.constant 0 : index
    %6 = vector.load %arg0[%c0_7, %c0_8] : memref<64x32xf32, #tpu.memory_space<vmem>>, vector<64x32xf32>
    %c0_9 = arith.constant 0 : index
    %c0_10 = arith.constant 0 : index
    %7 = vector.load %arg2[%c0_9, %c0_10] : memref<32x128xf32, #tpu.memory_space<vmem>>, vector<32x128xf32>
    %cst = arith.constant dense<0.000000e+00> : vector<64x128xf32>
    %8 = tpu.matmul %6, %7, %cst {dimension_numbers = #tpu.dot_dimension_numbers<[1], [0], [0], [1], [0, 0, 1, 1], [], []>} : vector<64x32xf32>, vector<32x128xf32>, vector<64x128xf32> -> vector<64x128xf32>
    %c0_11 = arith.constant 0 : index
    %c0_12 = arith.constant 0 : index
    %9 = vector.load %arg4[%c0_11, %c0_12] : memref<1x128xf32, #tpu.memory_space<vmem>>, vector<1x128xf32>
    %10 = vector.broadcast %9 : vector<1x128xf32> to vector<64x128xf32>
    %11 = arith.addf %8, %10 : vector<64x128xf32>
    %cst_13 = arith.constant 0.000000e+00 : f32
    %12 = vector.broadcast %cst_13 : f32 to vector<8x32xf32>
    %c0_i32 = arith.constant 0 : i32
    %13 = vector.broadcast %c0_i32 : i32 to vector<8x1xi32>
    %14 = arith.cmpi sgt, %5, %13 : vector<8x1xi32>
    %15 = vector.extract_strided_slice %11 {offsets = [0, 0], sizes = [8, 128], strides = [1, 1]} : vector<64x128xf32> to vector<8x128xf32>
    %cst_14 = arith.constant dense<0.000000e+00> : vector<8x128xf32>
    %16 = tpu.matmul %12, %0, %cst_14 {dimension_numbers = #tpu.dot_dimension_numbers<[1], [0], [0], [1], [0, 0, 1, 1], [], []>} : vector<8x32xf32>, vector<32x128xf32>, vector<8x128xf32> -> vector<8x128xf32>
    %17 = arith.addf %15, %16 : vector<8x128xf32>
    %18 = arith.negf %17 : vector<8x128xf32>
    %19 = math.exp %18 : vector<8x128xf32>
    %cst_15 = arith.constant 1.000000e+00 : f32
    %20 = vector.broadcast %cst_15 : f32 to vector<8x128xf32>
    %21 = arith.addf %20, %19 : vector<8x128xf32>
    %22 = arith.divf %20, %21 : vector<8x128xf32>
    %23 = math.tanh %17 : vector<8x128xf32>
    %24 = vector.extract_strided_slice %22 {offsets = [0, 0], sizes = [8, 32], strides = [1, 1]} : vector<8x128xf32> to vector<8x32xf32>
    %25 = vector.extract_strided_slice %22 {offsets = [0, 32], sizes = [8, 32], strides = [1, 1]} : vector<8x128xf32> to vector<8x32xf32>
    %26 = vector.extract_strided_slice %23 {offsets = [0, 64], sizes = [8, 32], strides = [1, 1]} : vector<8x128xf32> to vector<8x32xf32>
    %27 = vector.extract_strided_slice %22 {offsets = [0, 96], sizes = [8, 32], strides = [1, 1]} : vector<8x128xf32> to vector<8x32xf32>
    %28 = arith.mulf %25, %12 : vector<8x32xf32>
    %29 = arith.mulf %24, %26 : vector<8x32xf32>
    %30 = arith.addf %28, %29 : vector<8x32xf32>
    %31 = math.tanh %30 : vector<8x32xf32>
    %32 = arith.mulf %27, %31 : vector<8x32xf32>
    %33 = tpu.concatenate %32, %12 in 1 : vector<8x32xf32>, vector<8x32xf32> -> vector<8x64xf32>
    %cst_16 = arith.constant dense<0.000000e+00> : vector<8x128xf32>
    %34 = tpu.matmul %33, %1, %cst_16 {dimension_numbers = #tpu.dot_dimension_numbers<[1], [0], [0], [1], [0, 0, 1, 1], [], []>} : vector<8x64xf32>, vector<64x128xf32>, vector<8x128xf32> -> vector<8x128xf32>
    %35 = arith.addf %34, %4 : vector<8x128xf32>
    %36 = arith.negf %35 : vector<8x128xf32>
    %37 = math.exp %36 : vector<8x128xf32>
    %cst_17 = arith.constant 1.000000e+00 : f32
    %38 = vector.broadcast %cst_17 : f32 to vector<8x128xf32>
    %39 = arith.addf %38, %37 : vector<8x128xf32>
    %40 = arith.divf %38, %39 : vector<8x128xf32>
    %41 = math.tanh %35 : vector<8x128xf32>
    %42 = vector.extract_strided_slice %40 {offsets = [0, 0], sizes = [8, 32], strides = [1, 1]} : vector<8x128xf32> to vector<8x32xf32>
    %43 = vector.extract_strided_slice %40 {offsets = [0, 32], sizes = [8, 32], strides = [1, 1]} : vector<8x128xf32> to vector<8x32xf32>
    %44 = vector.extract_strided_slice %41 {offsets = [0, 64], sizes = [8, 32], strides = [1, 1]} : vector<8x128xf32> to vector<8x32xf32>
    %45 = vector.extract_strided_slice %40 {offsets = [0, 96], sizes = [8, 32], strides = [1, 1]} : vector<8x128xf32> to vector<8x32xf32>
    %46 = arith.mulf %43, %12 : vector<8x32xf32>
    %47 = arith.mulf %42, %44 : vector<8x32xf32>
    %48 = arith.addf %46, %47 : vector<8x32xf32>
    %49 = math.tanh %48 : vector<8x32xf32>
    %50 = arith.mulf %45, %49 : vector<8x32xf32>
    %51 = vector.shape_cast %14 : vector<8x1xi1> to vector<8x1xi1>
    %52 = vector.broadcast %51 : vector<8x1xi1> to vector<8x32xi1>
    %53 = arith.select %52, %32, %12 : vector<8x32xi1>, vector<8x32xf32>
    %54 = vector.shape_cast %14 : vector<8x1xi1> to vector<8x1xi1>
    %55 = vector.broadcast %54 : vector<8x1xi1> to vector<8x32xi1>
    %56 = arith.select %55, %30, %12 : vector<8x32xi1>, vector<8x32xf32>
    %57 = vector.shape_cast %14 : vector<8x1xi1> to vector<8x1xi1>
    %58 = vector.broadcast %57 : vector<8x1xi1> to vector<8x32xi1>
    %59 = arith.select %58, %50, %12 : vector<8x32xi1>, vector<8x32xf32>
    %60 = vector.shape_cast %14 : vector<8x1xi1> to vector<8x1xi1>
    %61 = vector.broadcast %60 : vector<8x1xi1> to vector<8x32xi1>
    %62 = arith.select %61, %48, %12 : vector<8x32xi1>, vector<8x32xf32>
    %c1_i32 = arith.constant 1 : i32
    %63 = vector.broadcast %c1_i32 : i32 to vector<8x1xi32>
    %64 = arith.cmpi sgt, %5, %63 : vector<8x1xi32>
    %65 = vector.extract_strided_slice %11 {offsets = [8, 0], sizes = [8, 128], strides = [1, 1]} : vector<64x128xf32> to vector<8x128xf32>
    %cst_18 = arith.constant dense<0.000000e+00> : vector<8x128xf32>
    %66 = tpu.matmul %53, %0, %cst_18 {dimension_numbers = #tpu.dot_dimension_numbers<[1], [0], [0], [1], [0, 0, 1, 1], [], []>} : vector<8x32xf32>, vector<32x128xf32>, vector<8x128xf32> -> vector<8x128xf32>
    %67 = arith.addf %65, %66 : vector<8x128xf32>
    %68 = arith.negf %67 : vector<8x128xf32>
    %69 = math.exp %68 : vector<8x128xf32>
    %cst_19 = arith.constant 1.000000e+00 : f32
    %70 = vector.broadcast %cst_19 : f32 to vector<8x128xf32>
    %71 = arith.addf %70, %69 : vector<8x128xf32>
    %72 = arith.divf %70, %71 : vector<8x128xf32>
    %73 = math.tanh %67 : vector<8x128xf32>
    %74 = vector.extract_strided_slice %72 {offsets = [0, 0], sizes = [8, 32], strides = [1, 1]} : vector<8x128xf32> to vector<8x32xf32>
    %75 = vector.extract_strided_slice %72 {offsets = [0, 32], sizes = [8, 32], strides = [1, 1]} : vector<8x128xf32> to vector<8x32xf32>
    %76 = vector.extract_strided_slice %73 {offsets = [0, 64], sizes = [8, 32], strides = [1, 1]} : vector<8x128xf32> to vector<8x32xf32>
    %77 = vector.extract_strided_slice %72 {offsets = [0, 96], sizes = [8, 32], strides = [1, 1]} : vector<8x128xf32> to vector<8x32xf32>
    %78 = arith.mulf %75, %56 : vector<8x32xf32>
    %79 = arith.mulf %74, %76 : vector<8x32xf32>
    %80 = arith.addf %78, %79 : vector<8x32xf32>
    %81 = math.tanh %80 : vector<8x32xf32>
    %82 = arith.mulf %77, %81 : vector<8x32xf32>
    %83 = tpu.concatenate %82, %59 in 1 : vector<8x32xf32>, vector<8x32xf32> -> vector<8x64xf32>
    %cst_20 = arith.constant dense<0.000000e+00> : vector<8x128xf32>
    %84 = tpu.matmul %83, %1, %cst_20 {dimension_numbers = #tpu.dot_dimension_numbers<[1], [0], [0], [1], [0, 0, 1, 1], [], []>} : vector<8x64xf32>, vector<64x128xf32>, vector<8x128xf32> -> vector<8x128xf32>
    %85 = arith.addf %84, %4 : vector<8x128xf32>
    %86 = arith.negf %85 : vector<8x128xf32>
    %87 = math.exp %86 : vector<8x128xf32>
    %cst_21 = arith.constant 1.000000e+00 : f32
    %88 = vector.broadcast %cst_21 : f32 to vector<8x128xf32>
    %89 = arith.addf %88, %87 : vector<8x128xf32>
    %90 = arith.divf %88, %89 : vector<8x128xf32>
    %91 = math.tanh %85 : vector<8x128xf32>
    %92 = vector.extract_strided_slice %90 {offsets = [0, 0], sizes = [8, 32], strides = [1, 1]} : vector<8x128xf32> to vector<8x32xf32>
    %93 = vector.extract_strided_slice %90 {offsets = [0, 32], sizes = [8, 32], strides = [1, 1]} : vector<8x128xf32> to vector<8x32xf32>
    %94 = vector.extract_strided_slice %91 {offsets = [0, 64], sizes = [8, 32], strides = [1, 1]} : vector<8x128xf32> to vector<8x32xf32>
    %95 = vector.extract_strided_slice %90 {offsets = [0, 96], sizes = [8, 32], strides = [1, 1]} : vector<8x128xf32> to vector<8x32xf32>
    %96 = arith.mulf %93, %62 : vector<8x32xf32>
    %97 = arith.mulf %92, %94 : vector<8x32xf32>
    %98 = arith.addf %96, %97 : vector<8x32xf32>
    %99 = math.tanh %98 : vector<8x32xf32>
    %100 = arith.mulf %95, %99 : vector<8x32xf32>
    %101 = vector.shape_cast %64 : vector<8x1xi1> to vector<8x1xi1>
    %102 = vector.broadcast %101 : vector<8x1xi1> to vector<8x32xi1>
    %103 = arith.select %102, %82, %53 : vector<8x32xi1>, vector<8x32xf32>
    %104 = vector.shape_cast %64 : vector<8x1xi1> to vector<8x1xi1>
    %105 = vector.broadcast %104 : vector<8x1xi1> to vector<8x32xi1>
    %106 = arith.select %105, %80, %56 : vector<8x32xi1>, vector<8x32xf32>
    %107 = vector.shape_cast %64 : vector<8x1xi1> to vector<8x1xi1>
    %108 = vector.broadcast %107 : vector<8x1xi1> to vector<8x32xi1>
    %109 = arith.select %108, %100, %59 : vector<8x32xi1>, vector<8x32xf32>
    %110 = vector.shape_cast %64 : vector<8x1xi1> to vector<8x1xi1>
    %111 = vector.broadcast %110 : vector<8x1xi1> to vector<8x32xi1>
    %112 = arith.select %111, %98, %62 : vector<8x32xi1>, vector<8x32xf32>
    %c2_i32 = arith.constant 2 : i32
    %113 = vector.broadcast %c2_i32 : i32 to vector<8x1xi32>
    %114 = arith.cmpi sgt, %5, %113 : vector<8x1xi32>
    %115 = vector.extract_strided_slice %11 {offsets = [16, 0], sizes = [8, 128], strides = [1, 1]} : vector<64x128xf32> to vector<8x128xf32>
    %cst_22 = arith.constant dense<0.000000e+00> : vector<8x128xf32>
    %116 = tpu.matmul %103, %0, %cst_22 {dimension_numbers = #tpu.dot_dimension_numbers<[1], [0], [0], [1], [0, 0, 1, 1], [], []>} : vector<8x32xf32>, vector<32x128xf32>, vector<8x128xf32> -> vector<8x128xf32>
    %117 = arith.addf %115, %116 : vector<8x128xf32>
    %118 = arith.negf %117 : vector<8x128xf32>
    %119 = math.exp %118 : vector<8x128xf32>
    %cst_23 = arith.constant 1.000000e+00 : f32
    %120 = vector.broadcast %cst_23 : f32 to vector<8x128xf32>
    %121 = arith.addf %120, %119 : vector<8x128xf32>
    %122 = arith.divf %120, %121 : vector<8x128xf32>
    %123 = math.tanh %117 : vector<8x128xf32>
    %124 = vector.extract_strided_slice %122 {offsets = [0, 0], sizes = [8, 32], strides = [1, 1]} : vector<8x128xf32> to vector<8x32xf32>
    %125 = vector.extract_strided_slice %122 {offsets = [0, 32], sizes = [8, 32], strides = [1, 1]} : vector<8x128xf32> to vector<8x32xf32>
    %126 = vector.extract_strided_slice %123 {offsets = [0, 64], sizes = [8, 32], strides = [1, 1]} : vector<8x128xf32> to vector<8x32xf32>
    %127 = vector.extract_strided_slice %122 {offsets = [0, 96], sizes = [8, 32], strides = [1, 1]} : vector<8x128xf32> to vector<8x32xf32>
    %128 = arith.mulf %125, %106 : vector<8x32xf32>
    %129 = arith.mulf %124, %126 : vector<8x32xf32>
    %130 = arith.addf %128, %129 : vector<8x32xf32>
    %131 = math.tanh %130 : vector<8x32xf32>
    %132 = arith.mulf %127, %131 : vector<8x32xf32>
    %133 = tpu.concatenate %132, %109 in 1 : vector<8x32xf32>, vector<8x32xf32> -> vector<8x64xf32>
    %cst_24 = arith.constant dense<0.000000e+00> : vector<8x128xf32>
    %134 = tpu.matmul %133, %1, %cst_24 {dimension_numbers = #tpu.dot_dimension_numbers<[1], [0], [0], [1], [0, 0, 1, 1], [], []>} : vector<8x64xf32>, vector<64x128xf32>, vector<8x128xf32> -> vector<8x128xf32>
    %135 = arith.addf %134, %4 : vector<8x128xf32>
    %136 = arith.negf %135 : vector<8x128xf32>
    %137 = math.exp %136 : vector<8x128xf32>
    %cst_25 = arith.constant 1.000000e+00 : f32
    %138 = vector.broadcast %cst_25 : f32 to vector<8x128xf32>
    %139 = arith.addf %138, %137 : vector<8x128xf32>
    %140 = arith.divf %138, %139 : vector<8x128xf32>
    %141 = math.tanh %135 : vector<8x128xf32>
    %142 = vector.extract_strided_slice %140 {offsets = [0, 0], sizes = [8, 32], strides = [1, 1]} : vector<8x128xf32> to vector<8x32xf32>
    %143 = vector.extract_strided_slice %140 {offsets = [0, 32], sizes = [8, 32], strides = [1, 1]} : vector<8x128xf32> to vector<8x32xf32>
    %144 = vector.extract_strided_slice %141 {offsets = [0, 64], sizes = [8, 32], strides = [1, 1]} : vector<8x128xf32> to vector<8x32xf32>
    %145 = vector.extract_strided_slice %140 {offsets = [0, 96], sizes = [8, 32], strides = [1, 1]} : vector<8x128xf32> to vector<8x32xf32>
    %146 = arith.mulf %143, %112 : vector<8x32xf32>
    %147 = arith.mulf %142, %144 : vector<8x32xf32>
    %148 = arith.addf %146, %147 : vector<8x32xf32>
    %149 = math.tanh %148 : vector<8x32xf32>
    %150 = arith.mulf %145, %149 : vector<8x32xf32>
    %151 = vector.shape_cast %114 : vector<8x1xi1> to vector<8x1xi1>
    %152 = vector.broadcast %151 : vector<8x1xi1> to vector<8x32xi1>
    %153 = arith.select %152, %132, %103 : vector<8x32xi1>, vector<8x32xf32>
    %154 = vector.shape_cast %114 : vector<8x1xi1> to vector<8x1xi1>
    %155 = vector.broadcast %154 : vector<8x1xi1> to vector<8x32xi1>
    %156 = arith.select %155, %130, %106 : vector<8x32xi1>, vector<8x32xf32>
    %157 = vector.shape_cast %114 : vector<8x1xi1> to vector<8x1xi1>
    %158 = vector.broadcast %157 : vector<8x1xi1> to vector<8x32xi1>
    %159 = arith.select %158, %150, %109 : vector<8x32xi1>, vector<8x32xf32>
    %160 = vector.shape_cast %114 : vector<8x1xi1> to vector<8x1xi1>
    %161 = vector.broadcast %160 : vector<8x1xi1> to vector<8x32xi1>
    %162 = arith.select %161, %148, %112 : vector<8x32xi1>, vector<8x32xf32>
    %c3_i32 = arith.constant 3 : i32
    %163 = vector.broadcast %c3_i32 : i32 to vector<8x1xi32>
    %164 = arith.cmpi sgt, %5, %163 : vector<8x1xi32>
    %165 = vector.extract_strided_slice %11 {offsets = [24, 0], sizes = [8, 128], strides = [1, 1]} : vector<64x128xf32> to vector<8x128xf32>
    %cst_26 = arith.constant dense<0.000000e+00> : vector<8x128xf32>
    %166 = tpu.matmul %153, %0, %cst_26 {dimension_numbers = #tpu.dot_dimension_numbers<[1], [0], [0], [1], [0, 0, 1, 1], [], []>} : vector<8x32xf32>, vector<32x128xf32>, vector<8x128xf32> -> vector<8x128xf32>
    %167 = arith.addf %165, %166 : vector<8x128xf32>
    %168 = arith.negf %167 : vector<8x128xf32>
    %169 = math.exp %168 : vector<8x128xf32>
    %cst_27 = arith.constant 1.000000e+00 : f32
    %170 = vector.broadcast %cst_27 : f32 to vector<8x128xf32>
    %171 = arith.addf %170, %169 : vector<8x128xf32>
    %172 = arith.divf %170, %171 : vector<8x128xf32>
    %173 = math.tanh %167 : vector<8x128xf32>
    %174 = vector.extract_strided_slice %172 {offsets = [0, 0], sizes = [8, 32], strides = [1, 1]} : vector<8x128xf32> to vector<8x32xf32>
    %175 = vector.extract_strided_slice %172 {offsets = [0, 32], sizes = [8, 32], strides = [1, 1]} : vector<8x128xf32> to vector<8x32xf32>
    %176 = vector.extract_strided_slice %173 {offsets = [0, 64], sizes = [8, 32], strides = [1, 1]} : vector<8x128xf32> to vector<8x32xf32>
    %177 = vector.extract_strided_slice %172 {offsets = [0, 96], sizes = [8, 32], strides = [1, 1]} : vector<8x128xf32> to vector<8x32xf32>
    %178 = arith.mulf %175, %156 : vector<8x32xf32>
    %179 = arith.mulf %174, %176 : vector<8x32xf32>
    %180 = arith.addf %178, %179 : vector<8x32xf32>
    %181 = math.tanh %180 : vector<8x32xf32>
    %182 = arith.mulf %177, %181 : vector<8x32xf32>
    %183 = tpu.concatenate %182, %159 in 1 : vector<8x32xf32>, vector<8x32xf32> -> vector<8x64xf32>
    %cst_28 = arith.constant dense<0.000000e+00> : vector<8x128xf32>
    %184 = tpu.matmul %183, %1, %cst_28 {dimension_numbers = #tpu.dot_dimension_numbers<[1], [0], [0], [1], [0, 0, 1, 1], [], []>} : vector<8x64xf32>, vector<64x128xf32>, vector<8x128xf32> -> vector<8x128xf32>
    %185 = arith.addf %184, %4 : vector<8x128xf32>
    %186 = arith.negf %185 : vector<8x128xf32>
    %187 = math.exp %186 : vector<8x128xf32>
    %cst_29 = arith.constant 1.000000e+00 : f32
    %188 = vector.broadcast %cst_29 : f32 to vector<8x128xf32>
    %189 = arith.addf %188, %187 : vector<8x128xf32>
    %190 = arith.divf %188, %189 : vector<8x128xf32>
    %191 = math.tanh %185 : vector<8x128xf32>
    %192 = vector.extract_strided_slice %190 {offsets = [0, 0], sizes = [8, 32], strides = [1, 1]} : vector<8x128xf32> to vector<8x32xf32>
    %193 = vector.extract_strided_slice %190 {offsets = [0, 32], sizes = [8, 32], strides = [1, 1]} : vector<8x128xf32> to vector<8x32xf32>
    %194 = vector.extract_strided_slice %191 {offsets = [0, 64], sizes = [8, 32], strides = [1, 1]} : vector<8x128xf32> to vector<8x32xf32>
    %195 = vector.extract_strided_slice %190 {offsets = [0, 96], sizes = [8, 32], strides = [1, 1]} : vector<8x128xf32> to vector<8x32xf32>
    %196 = arith.mulf %193, %162 : vector<8x32xf32>
    %197 = arith.mulf %192, %194 : vector<8x32xf32>
    %198 = arith.addf %196, %197 : vector<8x32xf32>
    %199 = math.tanh %198 : vector<8x32xf32>
    %200 = arith.mulf %195, %199 : vector<8x32xf32>
    %201 = vector.shape_cast %164 : vector<8x1xi1> to vector<8x1xi1>
    %202 = vector.broadcast %201 : vector<8x1xi1> to vector<8x32xi1>
    %203 = arith.select %202, %182, %153 : vector<8x32xi1>, vector<8x32xf32>
    %204 = vector.shape_cast %164 : vector<8x1xi1> to vector<8x1xi1>
    %205 = vector.broadcast %204 : vector<8x1xi1> to vector<8x32xi1>
    %206 = arith.select %205, %180, %156 : vector<8x32xi1>, vector<8x32xf32>
    %207 = vector.shape_cast %164 : vector<8x1xi1> to vector<8x1xi1>
    %208 = vector.broadcast %207 : vector<8x1xi1> to vector<8x32xi1>
    %209 = arith.select %208, %200, %159 : vector<8x32xi1>, vector<8x32xf32>
    %210 = vector.shape_cast %164 : vector<8x1xi1> to vector<8x1xi1>
    %211 = vector.broadcast %210 : vector<8x1xi1> to vector<8x32xi1>
    %212 = arith.select %211, %198, %162 : vector<8x32xi1>, vector<8x32xf32>
    %c4_i32 = arith.constant 4 : i32
    %213 = vector.broadcast %c4_i32 : i32 to vector<8x1xi32>
    %214 = arith.cmpi sgt, %5, %213 : vector<8x1xi32>
    %215 = vector.extract_strided_slice %11 {offsets = [32, 0], sizes = [8, 128], strides = [1, 1]} : vector<64x128xf32> to vector<8x128xf32>
    %cst_30 = arith.constant dense<0.000000e+00> : vector<8x128xf32>
    %216 = tpu.matmul %203, %0, %cst_30 {dimension_numbers = #tpu.dot_dimension_numbers<[1], [0], [0], [1], [0, 0, 1, 1], [], []>} : vector<8x32xf32>, vector<32x128xf32>, vector<8x128xf32> -> vector<8x128xf32>
    %217 = arith.addf %215, %216 : vector<8x128xf32>
    %218 = arith.negf %217 : vector<8x128xf32>
    %219 = math.exp %218 : vector<8x128xf32>
    %cst_31 = arith.constant 1.000000e+00 : f32
    %220 = vector.broadcast %cst_31 : f32 to vector<8x128xf32>
    %221 = arith.addf %220, %219 : vector<8x128xf32>
    %222 = arith.divf %220, %221 : vector<8x128xf32>
    %223 = math.tanh %217 : vector<8x128xf32>
    %224 = vector.extract_strided_slice %222 {offsets = [0, 0], sizes = [8, 32], strides = [1, 1]} : vector<8x128xf32> to vector<8x32xf32>
    %225 = vector.extract_strided_slice %222 {offsets = [0, 32], sizes = [8, 32], strides = [1, 1]} : vector<8x128xf32> to vector<8x32xf32>
    %226 = vector.extract_strided_slice %223 {offsets = [0, 64], sizes = [8, 32], strides = [1, 1]} : vector<8x128xf32> to vector<8x32xf32>
    %227 = vector.extract_strided_slice %222 {offsets = [0, 96], sizes = [8, 32], strides = [1, 1]} : vector<8x128xf32> to vector<8x32xf32>
    %228 = arith.mulf %225, %206 : vector<8x32xf32>
    %229 = arith.mulf %224, %226 : vector<8x32xf32>
    %230 = arith.addf %228, %229 : vector<8x32xf32>
    %231 = math.tanh %230 : vector<8x32xf32>
    %232 = arith.mulf %227, %231 : vector<8x32xf32>
    %233 = tpu.concatenate %232, %209 in 1 : vector<8x32xf32>, vector<8x32xf32> -> vector<8x64xf32>
    %cst_32 = arith.constant dense<0.000000e+00> : vector<8x128xf32>
    %234 = tpu.matmul %233, %1, %cst_32 {dimension_numbers = #tpu.dot_dimension_numbers<[1], [0], [0], [1], [0, 0, 1, 1], [], []>} : vector<8x64xf32>, vector<64x128xf32>, vector<8x128xf32> -> vector<8x128xf32>
    %235 = arith.addf %234, %4 : vector<8x128xf32>
    %236 = arith.negf %235 : vector<8x128xf32>
    %237 = math.exp %236 : vector<8x128xf32>
    %cst_33 = arith.constant 1.000000e+00 : f32
    %238 = vector.broadcast %cst_33 : f32 to vector<8x128xf32>
    %239 = arith.addf %238, %237 : vector<8x128xf32>
    %240 = arith.divf %238, %239 : vector<8x128xf32>
    %241 = math.tanh %235 : vector<8x128xf32>
    %242 = vector.extract_strided_slice %240 {offsets = [0, 0], sizes = [8, 32], strides = [1, 1]} : vector<8x128xf32> to vector<8x32xf32>
    %243 = vector.extract_strided_slice %240 {offsets = [0, 32], sizes = [8, 32], strides = [1, 1]} : vector<8x128xf32> to vector<8x32xf32>
    %244 = vector.extract_strided_slice %241 {offsets = [0, 64], sizes = [8, 32], strides = [1, 1]} : vector<8x128xf32> to vector<8x32xf32>
    %245 = vector.extract_strided_slice %240 {offsets = [0, 96], sizes = [8, 32], strides = [1, 1]} : vector<8x128xf32> to vector<8x32xf32>
    %246 = arith.mulf %243, %212 : vector<8x32xf32>
    %247 = arith.mulf %242, %244 : vector<8x32xf32>
    %248 = arith.addf %246, %247 : vector<8x32xf32>
    %249 = math.tanh %248 : vector<8x32xf32>
    %250 = arith.mulf %245, %249 : vector<8x32xf32>
    %251 = vector.shape_cast %214 : vector<8x1xi1> to vector<8x1xi1>
    %252 = vector.broadcast %251 : vector<8x1xi1> to vector<8x32xi1>
    %253 = arith.select %252, %232, %203 : vector<8x32xi1>, vector<8x32xf32>
    %254 = vector.shape_cast %214 : vector<8x1xi1> to vector<8x1xi1>
    %255 = vector.broadcast %254 : vector<8x1xi1> to vector<8x32xi1>
    %256 = arith.select %255, %230, %206 : vector<8x32xi1>, vector<8x32xf32>
    %257 = vector.shape_cast %214 : vector<8x1xi1> to vector<8x1xi1>
    %258 = vector.broadcast %257 : vector<8x1xi1> to vector<8x32xi1>
    %259 = arith.select %258, %250, %209 : vector<8x32xi1>, vector<8x32xf32>
    %260 = vector.shape_cast %214 : vector<8x1xi1> to vector<8x1xi1>
    %261 = vector.broadcast %260 : vector<8x1xi1> to vector<8x32xi1>
    %262 = arith.select %261, %248, %212 : vector<8x32xi1>, vector<8x32xf32>
    %c5_i32 = arith.constant 5 : i32
    %263 = vector.broadcast %c5_i32 : i32 to vector<8x1xi32>
    %264 = arith.cmpi sgt, %5, %263 : vector<8x1xi32>
    %265 = vector.extract_strided_slice %11 {offsets = [40, 0], sizes = [8, 128], strides = [1, 1]} : vector<64x128xf32> to vector<8x128xf32>
    %cst_34 = arith.constant dense<0.000000e+00> : vector<8x128xf32>
    %266 = tpu.matmul %253, %0, %cst_34 {dimension_numbers = #tpu.dot_dimension_numbers<[1], [0], [0], [1], [0, 0, 1, 1], [], []>} : vector<8x32xf32>, vector<32x128xf32>, vector<8x128xf32> -> vector<8x128xf32>
    %267 = arith.addf %265, %266 : vector<8x128xf32>
    %268 = arith.negf %267 : vector<8x128xf32>
    %269 = math.exp %268 : vector<8x128xf32>
    %cst_35 = arith.constant 1.000000e+00 : f32
    %270 = vector.broadcast %cst_35 : f32 to vector<8x128xf32>
    %271 = arith.addf %270, %269 : vector<8x128xf32>
    %272 = arith.divf %270, %271 : vector<8x128xf32>
    %273 = math.tanh %267 : vector<8x128xf32>
    %274 = vector.extract_strided_slice %272 {offsets = [0, 0], sizes = [8, 32], strides = [1, 1]} : vector<8x128xf32> to vector<8x32xf32>
    %275 = vector.extract_strided_slice %272 {offsets = [0, 32], sizes = [8, 32], strides = [1, 1]} : vector<8x128xf32> to vector<8x32xf32>
    %276 = vector.extract_strided_slice %273 {offsets = [0, 64], sizes = [8, 32], strides = [1, 1]} : vector<8x128xf32> to vector<8x32xf32>
    %277 = vector.extract_strided_slice %272 {offsets = [0, 96], sizes = [8, 32], strides = [1, 1]} : vector<8x128xf32> to vector<8x32xf32>
    %278 = arith.mulf %275, %256 : vector<8x32xf32>
    %279 = arith.mulf %274, %276 : vector<8x32xf32>
    %280 = arith.addf %278, %279 : vector<8x32xf32>
    %281 = math.tanh %280 : vector<8x32xf32>
    %282 = arith.mulf %277, %281 : vector<8x32xf32>
    %283 = tpu.concatenate %282, %259 in 1 : vector<8x32xf32>, vector<8x32xf32> -> vector<8x64xf32>
    %cst_36 = arith.constant dense<0.000000e+00> : vector<8x128xf32>
    %284 = tpu.matmul %283, %1, %cst_36 {dimension_numbers = #tpu.dot_dimension_numbers<[1], [0], [0], [1], [0, 0, 1, 1], [], []>} : vector<8x64xf32>, vector<64x128xf32>, vector<8x128xf32> -> vector<8x128xf32>
    %285 = arith.addf %284, %4 : vector<8x128xf32>
    %286 = arith.negf %285 : vector<8x128xf32>
    %287 = math.exp %286 : vector<8x128xf32>
    %cst_37 = arith.constant 1.000000e+00 : f32
    %288 = vector.broadcast %cst_37 : f32 to vector<8x128xf32>
    %289 = arith.addf %288, %287 : vector<8x128xf32>
    %290 = arith.divf %288, %289 : vector<8x128xf32>
    %291 = math.tanh %285 : vector<8x128xf32>
    %292 = vector.extract_strided_slice %290 {offsets = [0, 0], sizes = [8, 32], strides = [1, 1]} : vector<8x128xf32> to vector<8x32xf32>
    %293 = vector.extract_strided_slice %290 {offsets = [0, 32], sizes = [8, 32], strides = [1, 1]} : vector<8x128xf32> to vector<8x32xf32>
    %294 = vector.extract_strided_slice %291 {offsets = [0, 64], sizes = [8, 32], strides = [1, 1]} : vector<8x128xf32> to vector<8x32xf32>
    %295 = vector.extract_strided_slice %290 {offsets = [0, 96], sizes = [8, 32], strides = [1, 1]} : vector<8x128xf32> to vector<8x32xf32>
    %296 = arith.mulf %293, %262 : vector<8x32xf32>
    %297 = arith.mulf %292, %294 : vector<8x32xf32>
    %298 = arith.addf %296, %297 : vector<8x32xf32>
    %299 = math.tanh %298 : vector<8x32xf32>
    %300 = arith.mulf %295, %299 : vector<8x32xf32>
    %301 = vector.shape_cast %264 : vector<8x1xi1> to vector<8x1xi1>
    %302 = vector.broadcast %301 : vector<8x1xi1> to vector<8x32xi1>
    %303 = arith.select %302, %282, %253 : vector<8x32xi1>, vector<8x32xf32>
    %304 = vector.shape_cast %264 : vector<8x1xi1> to vector<8x1xi1>
    %305 = vector.broadcast %304 : vector<8x1xi1> to vector<8x32xi1>
    %306 = arith.select %305, %280, %256 : vector<8x32xi1>, vector<8x32xf32>
    %307 = vector.shape_cast %264 : vector<8x1xi1> to vector<8x1xi1>
    %308 = vector.broadcast %307 : vector<8x1xi1> to vector<8x32xi1>
    %309 = arith.select %308, %300, %259 : vector<8x32xi1>, vector<8x32xf32>
    %310 = vector.shape_cast %264 : vector<8x1xi1> to vector<8x1xi1>
    %311 = vector.broadcast %310 : vector<8x1xi1> to vector<8x32xi1>
    %312 = arith.select %311, %298, %262 : vector<8x32xi1>, vector<8x32xf32>
    %c6_i32 = arith.constant 6 : i32
    %313 = vector.broadcast %c6_i32 : i32 to vector<8x1xi32>
    %314 = arith.cmpi sgt, %5, %313 : vector<8x1xi32>
    %315 = vector.extract_strided_slice %11 {offsets = [48, 0], sizes = [8, 128], strides = [1, 1]} : vector<64x128xf32> to vector<8x128xf32>
    %cst_38 = arith.constant dense<0.000000e+00> : vector<8x128xf32>
    %316 = tpu.matmul %303, %0, %cst_38 {dimension_numbers = #tpu.dot_dimension_numbers<[1], [0], [0], [1], [0, 0, 1, 1], [], []>} : vector<8x32xf32>, vector<32x128xf32>, vector<8x128xf32> -> vector<8x128xf32>
    %317 = arith.addf %315, %316 : vector<8x128xf32>
    %318 = arith.negf %317 : vector<8x128xf32>
    %319 = math.exp %318 : vector<8x128xf32>
    %cst_39 = arith.constant 1.000000e+00 : f32
    %320 = vector.broadcast %cst_39 : f32 to vector<8x128xf32>
    %321 = arith.addf %320, %319 : vector<8x128xf32>
    %322 = arith.divf %320, %321 : vector<8x128xf32>
    %323 = math.tanh %317 : vector<8x128xf32>
    %324 = vector.extract_strided_slice %322 {offsets = [0, 0], sizes = [8, 32], strides = [1, 1]} : vector<8x128xf32> to vector<8x32xf32>
    %325 = vector.extract_strided_slice %322 {offsets = [0, 32], sizes = [8, 32], strides = [1, 1]} : vector<8x128xf32> to vector<8x32xf32>
    %326 = vector.extract_strided_slice %323 {offsets = [0, 64], sizes = [8, 32], strides = [1, 1]} : vector<8x128xf32> to vector<8x32xf32>
    %327 = vector.extract_strided_slice %322 {offsets = [0, 96], sizes = [8, 32], strides = [1, 1]} : vector<8x128xf32> to vector<8x32xf32>
    %328 = arith.mulf %325, %306 : vector<8x32xf32>
    %329 = arith.mulf %324, %326 : vector<8x32xf32>
    %330 = arith.addf %328, %329 : vector<8x32xf32>
    %331 = math.tanh %330 : vector<8x32xf32>
    %332 = arith.mulf %327, %331 : vector<8x32xf32>
    %333 = tpu.concatenate %332, %309 in 1 : vector<8x32xf32>, vector<8x32xf32> -> vector<8x64xf32>
    %cst_40 = arith.constant dense<0.000000e+00> : vector<8x128xf32>
    %334 = tpu.matmul %333, %1, %cst_40 {dimension_numbers = #tpu.dot_dimension_numbers<[1], [0], [0], [1], [0, 0, 1, 1], [], []>} : vector<8x64xf32>, vector<64x128xf32>, vector<8x128xf32> -> vector<8x128xf32>
    %335 = arith.addf %334, %4 : vector<8x128xf32>
    %336 = arith.negf %335 : vector<8x128xf32>
    %337 = math.exp %336 : vector<8x128xf32>
    %cst_41 = arith.constant 1.000000e+00 : f32
    %338 = vector.broadcast %cst_41 : f32 to vector<8x128xf32>
    %339 = arith.addf %338, %337 : vector<8x128xf32>
    %340 = arith.divf %338, %339 : vector<8x128xf32>
    %341 = math.tanh %335 : vector<8x128xf32>
    %342 = vector.extract_strided_slice %340 {offsets = [0, 0], sizes = [8, 32], strides = [1, 1]} : vector<8x128xf32> to vector<8x32xf32>
    %343 = vector.extract_strided_slice %340 {offsets = [0, 32], sizes = [8, 32], strides = [1, 1]} : vector<8x128xf32> to vector<8x32xf32>
    %344 = vector.extract_strided_slice %341 {offsets = [0, 64], sizes = [8, 32], strides = [1, 1]} : vector<8x128xf32> to vector<8x32xf32>
    %345 = vector.extract_strided_slice %340 {offsets = [0, 96], sizes = [8, 32], strides = [1, 1]} : vector<8x128xf32> to vector<8x32xf32>
    %346 = arith.mulf %343, %312 : vector<8x32xf32>
    %347 = arith.mulf %342, %344 : vector<8x32xf32>
    %348 = arith.addf %346, %347 : vector<8x32xf32>
    %349 = math.tanh %348 : vector<8x32xf32>
    %350 = arith.mulf %345, %349 : vector<8x32xf32>
    %351 = vector.shape_cast %314 : vector<8x1xi1> to vector<8x1xi1>
    %352 = vector.broadcast %351 : vector<8x1xi1> to vector<8x32xi1>
    %353 = arith.select %352, %332, %303 : vector<8x32xi1>, vector<8x32xf32>
    %354 = vector.shape_cast %314 : vector<8x1xi1> to vector<8x1xi1>
    %355 = vector.broadcast %354 : vector<8x1xi1> to vector<8x32xi1>
    %356 = arith.select %355, %330, %306 : vector<8x32xi1>, vector<8x32xf32>
    %357 = vector.shape_cast %314 : vector<8x1xi1> to vector<8x1xi1>
    %358 = vector.broadcast %357 : vector<8x1xi1> to vector<8x32xi1>
    %359 = arith.select %358, %350, %309 : vector<8x32xi1>, vector<8x32xf32>
    %360 = vector.shape_cast %314 : vector<8x1xi1> to vector<8x1xi1>
    %361 = vector.broadcast %360 : vector<8x1xi1> to vector<8x32xi1>
    %362 = arith.select %361, %348, %312 : vector<8x32xi1>, vector<8x32xf32>
    %c7_i32 = arith.constant 7 : i32
    %363 = vector.broadcast %c7_i32 : i32 to vector<8x1xi32>
    %364 = arith.cmpi sgt, %5, %363 : vector<8x1xi32>
    %365 = vector.extract_strided_slice %11 {offsets = [56, 0], sizes = [8, 128], strides = [1, 1]} : vector<64x128xf32> to vector<8x128xf32>
    %cst_42 = arith.constant dense<0.000000e+00> : vector<8x128xf32>
    %366 = tpu.matmul %353, %0, %cst_42 {dimension_numbers = #tpu.dot_dimension_numbers<[1], [0], [0], [1], [0, 0, 1, 1], [], []>} : vector<8x32xf32>, vector<32x128xf32>, vector<8x128xf32> -> vector<8x128xf32>
    %367 = arith.addf %365, %366 : vector<8x128xf32>
    %368 = arith.negf %367 : vector<8x128xf32>
    %369 = math.exp %368 : vector<8x128xf32>
    %cst_43 = arith.constant 1.000000e+00 : f32
    %370 = vector.broadcast %cst_43 : f32 to vector<8x128xf32>
    %371 = arith.addf %370, %369 : vector<8x128xf32>
    %372 = arith.divf %370, %371 : vector<8x128xf32>
    %373 = math.tanh %367 : vector<8x128xf32>
    %374 = vector.extract_strided_slice %372 {offsets = [0, 0], sizes = [8, 32], strides = [1, 1]} : vector<8x128xf32> to vector<8x32xf32>
    %375 = vector.extract_strided_slice %372 {offsets = [0, 32], sizes = [8, 32], strides = [1, 1]} : vector<8x128xf32> to vector<8x32xf32>
    %376 = vector.extract_strided_slice %373 {offsets = [0, 64], sizes = [8, 32], strides = [1, 1]} : vector<8x128xf32> to vector<8x32xf32>
    %377 = vector.extract_strided_slice %372 {offsets = [0, 96], sizes = [8, 32], strides = [1, 1]} : vector<8x128xf32> to vector<8x32xf32>
    %378 = arith.mulf %375, %356 : vector<8x32xf32>
    %379 = arith.mulf %374, %376 : vector<8x32xf32>
    %380 = arith.addf %378, %379 : vector<8x32xf32>
    %381 = math.tanh %380 : vector<8x32xf32>
    %382 = arith.mulf %377, %381 : vector<8x32xf32>
    %383 = tpu.concatenate %382, %359 in 1 : vector<8x32xf32>, vector<8x32xf32> -> vector<8x64xf32>
    %cst_44 = arith.constant dense<0.000000e+00> : vector<8x128xf32>
    %384 = tpu.matmul %383, %1, %cst_44 {dimension_numbers = #tpu.dot_dimension_numbers<[1], [0], [0], [1], [0, 0, 1, 1], [], []>} : vector<8x64xf32>, vector<64x128xf32>, vector<8x128xf32> -> vector<8x128xf32>
    %385 = arith.addf %384, %4 : vector<8x128xf32>
    %386 = arith.negf %385 : vector<8x128xf32>
    %387 = math.exp %386 : vector<8x128xf32>
    %cst_45 = arith.constant 1.000000e+00 : f32
    %388 = vector.broadcast %cst_45 : f32 to vector<8x128xf32>
    %389 = arith.addf %388, %387 : vector<8x128xf32>
    %390 = arith.divf %388, %389 : vector<8x128xf32>
    %391 = math.tanh %385 : vector<8x128xf32>
    %392 = vector.extract_strided_slice %390 {offsets = [0, 0], sizes = [8, 32], strides = [1, 1]} : vector<8x128xf32> to vector<8x32xf32>
    %393 = vector.extract_strided_slice %390 {offsets = [0, 32], sizes = [8, 32], strides = [1, 1]} : vector<8x128xf32> to vector<8x32xf32>
    %394 = vector.extract_strided_slice %391 {offsets = [0, 64], sizes = [8, 32], strides = [1, 1]} : vector<8x128xf32> to vector<8x32xf32>
    %395 = vector.extract_strided_slice %390 {offsets = [0, 96], sizes = [8, 32], strides = [1, 1]} : vector<8x128xf32> to vector<8x32xf32>
    %396 = arith.mulf %393, %362 : vector<8x32xf32>
    %397 = arith.mulf %392, %394 : vector<8x32xf32>
    %398 = arith.addf %396, %397 : vector<8x32xf32>
    %399 = math.tanh %398 : vector<8x32xf32>
    %400 = arith.mulf %395, %399 : vector<8x32xf32>
    %401 = vector.shape_cast %364 : vector<8x1xi1> to vector<8x1xi1>
    %402 = vector.broadcast %401 : vector<8x1xi1> to vector<8x32xi1>
    %403 = arith.select %402, %382, %353 : vector<8x32xi1>, vector<8x32xf32>
    %404 = vector.shape_cast %364 : vector<8x1xi1> to vector<8x1xi1>
    %405 = vector.broadcast %404 : vector<8x1xi1> to vector<8x32xi1>
    %406 = arith.select %405, %400, %359 : vector<8x32xi1>, vector<8x32xf32>
    %407 = tpu.concatenate %403, %406 in 1 : vector<8x32xf32>, vector<8x32xf32> -> vector<8x64xf32>
    %c0_46 = arith.constant 0 : index
    %c0_47 = arith.constant 0 : index
    %408 = vector.load %arg7[%c0_46, %c0_47] : memref<64x4xf32, #tpu.memory_space<vmem>>, vector<64x4xf32>
    %cst_48 = arith.constant dense<0.000000e+00> : vector<8x4xf32>
    %409 = tpu.matmul %407, %408, %cst_48 {dimension_numbers = #tpu.dot_dimension_numbers<[1], [0], [0], [1], [0, 0, 1, 1], [], []>} : vector<8x64xf32>, vector<64x4xf32>, vector<8x4xf32> -> vector<8x4xf32>
    %c0_49 = arith.constant 0 : index
    %c0_50 = arith.constant 0 : index
    %410 = vector.load %arg8[%c0_49, %c0_50] : memref<1x4xf32, #tpu.memory_space<vmem>>, vector<1x4xf32>
    %411 = vector.broadcast %410 : vector<1x4xf32> to vector<8x4xf32>
    %412 = arith.addf %409, %411 : vector<8x4xf32>
    %c0_51 = arith.constant 0 : index
    %c0_52 = arith.constant 0 : index
    %413 = vector.load %arg9[%c0_51, %c0_52] : memref<8x4xf32, #tpu.memory_space<vmem>>, vector<8x4xf32>
    tpu.vector_store %arg9[%c0_51, %c0_52], %412 {strides = array<i32>} : memref<8x4xf32, #tpu.memory_space<vmem>>, vector<8x4xf32>,
    return
  }
}

</mosaic_0001>

<bundles_post_ra>
// kernel: tpu_custom_call.1
= control target key start
LH: loop header
LB: loop body
LE: loop exit
PB: predicated region body
PF: predicated region fallthrough
CT: control target
= control target key end

     0   :  { %v2630_v2 = vmov 0.0   ;;  %vm2631_vm0 = vmmov 0   ;;  %vm71_vm1 = vcmask 261120   ;;  %v2632_v11 = vmov 0   ;;  %s2633_s11 = smov 64   ;;  %s2634_s12 = smov 32   ;;  %s3502_s2 = inlined_call_operand.vmem [shape: f32[32,128], index: 2, kind: input, shape index: {}]   ;;  %s3503_s3 = inlined_call_operand.vmem [shape: f32[32,128], index: 3, kind: input, shape index: {}]   ;;  %s3504_s0 = inlined_call_operand.vmem [shape: f32[64,32], index: 0, kind: input, shape index: {}]   ;;  %s3505_s1 = inlined_call_operand.vmem [shape: s32[8,1], index: 1, kind: input, shape index: {}]   ;;  %s3506_s4 = inlined_call_operand.vmem [shape: f32[1,128], index: 4, kind: input, shape index: {}]   ;;  %s3507_s5 = inlined_call_operand.vmem [shape: f32[64,128], index: 5, kind: input, shape index: {}]   ;;  %s3508_s6 = inlined_call_operand.vmem [shape: f32[1,128], index: 6, kind: input, shape index: {}]   ;;  %s3509_s7 = inlined_call_operand.vmem [shape: f32[64,4], index: 7, kind: input, shape index: {}]   ;;  %s3510_s8 = inlined_call_operand.vmem [shape: f32[1,4], index: 8, kind: input, shape index: {}]   ;;  %s3511_s9 = inlined_call_operand.vmem [shape: f32[8,4], index: 9, kind: output, shape index: {}]  }
   0x1   :  { %v63_v0 = vld [vmem:[%s3502_s2 + $0x18] sm:$0xff]  ;;  %v62_v1 = vld [vmem:[%s3502_s2 + $0x10] sm:$0xff]  ;;  %2221 = vmatprep.subr.mxu1 %v2630_v2  ;;  %2229 = vmatprep.mubr.msk.f32.mxu1 %vm2631_vm0, %v2630_v2  ;;  %v61_v5 = vld [vmem:[%s3502_s2 + $0x8] sm:$0xff]  ;;  %vm305_vm4 = vcmask 523264  }
   0x2   :  { %v2695_v3 = vld [vmem:[%s3503_s3 + $0x18] sm:$0xff]  ;;  %2201 = vmatprep.subr.mxu0 %v63_v0  ;;  %v2703_v4 = vld [vmem:[%s3503_s3 + $0x10] sm:$0xff]  ;;  %v52_v6 = vld [vmem:[%s3504_s0] sm:$0xff]  ;;  %2485 = vset.pattern.permute.xlu1 %v2632_v11 }
   0x3   :  { %2222 = vmatpush3.msra.mxu1 %v2695_v3  ;;  %2202 = vmatpush3.msra.mxu0 %v63_v0  ;;  %v2716_v7 = vld [vmem:[%s3503_s3 + $0x8] sm:$0xff]  ;;  %v60_v8 = vld [vmem:[%s3502_s2] sm:$0xff]  ;;  %v54_v31 = vld [vmem:[%s3504_s0 + $0x10] sm:$0xff] }
   0x4   :  { %2223 = vmatprep.subr.mxu1 %v2630_v2  ;;  %2203 = vmatprep.subr.mxu0 %v62_v1  ;;  %v2726_v9 = vld [vmem:[%s3503_s3] sm:$0xff]  ;;  %v53_v10 = vld [vmem:[%s3504_s0 + $0x8] sm:$0xff]  ;;  %v55_v32 = vld [vmem:[%s3504_s0 + $0x18] sm:$0xff] }
   0x5   :  { %2224 = vmatpush3.msra.mxu1 %v2703_v4  ;;  %2204 = vmatpush3.msra.mxu0 %v62_v1  ;;  %v2752_v12 = vld [vmem:[%s3505_s1] sm:$0xff]  ;;  %v2779_v33 = vld [vmem:[%s3507_s5 + $0x38] sm:$0xff]  ;;  %v2785_v34 = vld [vmem:[%s3507_s5 + $0x30] sm:$0xff] }
   0x6   :  { %2225 = vmatprep.subr.mxu1 %v2630_v2  ;;  %2205 = vmatprep.subr.mxu0 %v61_v5  ;;  %vm201_vm2 = vcmp.gt.s32.totalorder %v2752_v12, 0  ;;  %v2762_v16 = vld [vmem:[%s3506_s4] ss:$0 sm:$0xff]  ;;  %v2796_v36 = vld [vmem:[%s3507_s5 + $0x28] sm:$0xff]  ;;  %v58_v39 = vld [vmem:[%s3504_s0 + $0x30] sm:$0xff]  ;;  %vm412_vm5 = vcmp.gt.s32.totalorder %v2752_v12, 1 }
   0x7   :  { %2209 = vmatprep.mubr.msk.f32.mxu0 %vm71_vm1, %v52_v6  ;;  %2206 = vmatpush3.msra.mxu0 %v61_v5  ;;  %v403_v13 = vsel %vm201_vm2, 1, %v2632_v11  ;;  %v56_v35 = vld [vmem:[%s3504_s0 + $0x20] sm:$0xff]  ;;  %v57_v37 = vld [vmem:[%s3504_s0 + $0x28] sm:$0xff]  ;;  %v2818_v40 = vld [vmem:[%s3507_s5 + $0x18] sm:$0xff]  ;;  %vm628_vm7 = vcmp.gt.s32.totalorder %v2752_v12, 2  ;;  %vm844_vm9 = vcmp.gt.s32.totalorder %v2752_v12, 3 }
   0x8   :  { %2226 = vmatpush3.msra.mxu1 %v2716_v7  ;;  %2207 = vmatprep.subr.mxu0 %v60_v8  ;;  %v2807_v38 = vld [vmem:[%s3507_s5 + $0x20] sm:$0xff]  ;;  %v59_v41 = vld [vmem:[%s3504_s0 + $0x38] sm:$0xff]  ;;  %v2829_v43 = vld [vmem:[%s3507_s5 + $0x10] sm:$0xff]  ;;  %vm1060_vm11 = vcmp.gt.s32.totalorder %v2752_v12, 4  ;;  %vm1276_vm13 = vcmp.gt.s32.totalorder %v2752_v12, 5 }
   0x9   :  { %2227 = vmatprep.subr.mxu1 %v2630_v2  ;;  %2208 = vmatpush3.msra.mxu0 %v60_v8  ;;  %v2838_v44 = vld [vmem:[%s3507_s5 + $0x8] sm:$0xff]  ;;  %v2847_v45 = vld [vmem:[%s3507_s5] sm:$0xff] }
   0xa   :  { %2228 = vmatpush3.msra.mxu1 %v2726_v9  ;;  %2210 = vmatmul.mubr.msk.f32.vlgmr.msra.gmra.mxu0 %vm71_vm1, %v53_v10  ;;  %v2909_v59 = vld [vmem:[%s3508_s6] ss:$0 sm:$0xff] }
   0xb   :  { %2230 = vmatmul.mubr.f32.vlgmr.msra.gmra.mxu1 %v2630_v2  ;;  %2232 = vmatprep.subr.mxu0 %v2630_v2 }
   0xc   :  { %2251 = vmatprep.subr.mxu1 %v2630_v2  ;;  %2259 = vmatprep.mubr.msk.f32.mxu1 %vm2631_vm0, %v2630_v2 }
   0xd   :  { %2252 = vmatpush3.msra.mxu1 %v2695_v3  ;;  %2486 = vset.pattern.permute.xlu0 %v2632_v11 }
   0xe   :  { %2253 = vmatprep.subr.mxu1 %v2630_v2  ;;  %405 = vperm.xlu1 %2485, %v403_v13  }
   0xf   :  { %2254 = vmatpush3.msra.mxu1 %v2703_v4  ;;  %2212 = vmatprep.mubr.msk.f32.mxu0 %vm71_vm1, %v54_v31 }
  0x10   :  { %2255 = vmatprep.subr.mxu1 %v2630_v2  ;;  %2233 = vmatpush3.msra.mxu0 %v2779_v33 }
  0x11   :  { %2256 = vmatpush3.msra.mxu1 %v2716_v7  ;;  %2234 = vmatprep.subr.mxu0 %v2630_v2 }
  0x12   :  { %2257 = vmatprep.subr.mxu1 %v2630_v2  ;;  %2213 = vmatmul.mubr.msk.f32.gmra.mxu0 %vm71_vm1, %v55_v32 }
  0x13   :  { %2258 = vmatpush3.msra.mxu1 %v2726_v9  ;;  %2235 = vmatpush3.msra.mxu0 %v2785_v34 }
  0x14   :  { %2262 = vmatprep.subr.mxu1 %v2630_v2  ;;  %2215 = vmatprep.mubr.msk.f32.mxu0 %vm71_vm1, %v56_v35 }
  0x15   :  { %2236 = vmatprep.subr.mxu0 %v2630_v2 }
  0x16   :  { %2237 = vmatpush3.msra.mxu0 %v2796_v36 }
  0x17   :  { %2238 = vmatprep.subr.mxu0 %v2630_v2  ;;  %2216 = vmatmul.mubr.msk.f32.gmra.mxu0 %vm71_vm1, %v57_v37 }
  0x18   :  { %2239 = vmatpush3.msra.mxu0 %v2807_v38  ;;  %2218 = vmatprep.mubr.msk.f32.mxu0 %vm71_vm1, %v58_v39 }
  0x19   :  { %2240 = vmatprep.subr.mxu0 %v2630_v2 }
  0x1a   :  { %2241 = vmatpush3.msra.mxu0 %v2818_v40 }
  0x1b   :  { %2242 = vmatprep.subr.mxu0 %v2630_v2  ;;  %2219 = vmatmul.mubr.msk.f32.gmra.mxu0 %vm71_vm1, %v59_v41 }
  0x1c   :  { %2243 = vmatpush3.msra.mxu0 %v2829_v43  ;;  %2248 = vmatprep.mubr.msk.f32.mxu0 %vm2631_vm0, %v2630_v2 }
  0x1d   :  { %2244 = vmatprep.subr.mxu0 %v2630_v2 }
  0x1e   :  { %2245 = vmatpush3.msra.mxu0 %v2838_v44 }
  0x1f   :  { %2246 = vmatprep.subr.mxu0 %v2630_v2 }
  0x20   :  { %2247 = vmatpush3.msra.mxu0 %v2847_v45 }
  0x21   :  { %2281 = vmatprep.subr.mxu0 %v2630_v2 }
  0x89   :  { %v2853_v46 = vpop.permute.xlu1 %405 }
  0x8a   :  { %vm407_vm3 = vcmp.eq.s32.totalorder %v2853_v46, 1 }
  0xca   :  { %v2757_v14 = vpop.f32.mrf.mxu0 }
  0xcb   :  { %v271_v15 = vpop.f32.mrf.mxu1  ;;  %v168_v60 = vadd.f32 %v2757_v14, %v2762_v16 }
  0xcc   :  { %v162_v17 = vpop.f32.mrf.mxu0 }
  0xcd   :  { %v2231_v18 = vpop.f32.mrf.mxu1  ;;  %v163_v19 = vadd.f32 %v2762_v16, %v162_v17 }
  0xcf   :  { %v275_v20 = vadd.f32 %v271_v15, %v163_v19 }
  0xd1   :  { %2487 = vtanh.f32 %v275_v20  ;;  %v2035_v22 = vmul.f32 -1.442695, %v275_v20 }
  0xd2   :  { %v2894_v53 = vpop.f32.mrf.mxu0 }
  0xd3   :  { %2489 = vpow2.f32 %v2035_v22 }
  0xd4   :  { %v2896_v54 = vpop.f32.mrf.mxu0 }
  0xd7   :  { %v2898_v55 = vpop.f32.mrf.mxu0 }
  0xd9   :  { %v2900_v56 = vpop.f32.mrf.mxu0 }
  0xdb   :  { %v2902_v57 = vpop.f32.mrf.mxu0 }
  0xdd   :  { %v2904_v58 = vpop.f32.mrf.mxu0 }
  0xde   :  { %v2488_v21 = vpop.eup %2487 }
  0xdf   :  { %285 = vrot.lane.b32.xlu0 %v2488_v21, %s2633_s11 }
  0xe0   :  { %v2490_v23 = vpop.eup %2489 }
  0xe1   :  { %v279_v24 = vadd.f32 1.0, %v2490_v23 }
  0xe3   :  { %2491 = vrcp.f32 %v279_v24 }
  0xf0   :  { %v2492_v25 = vpop.eup %2491 }
  0xf1   :  { %v283_v28 = vmul.f32 0.0, %v2492_v25 }
 0x151   :  { %v286_v26 = vpop.permute.xlu0 %285 }
 0x152   :  { %v288_v27 = vmul.f32 %v2492_v25, %v286_v26 }
 0x154   :  { %290 = vrot.lane.b32.xlu0 %v288_v27, %s2634_s12 }
 0x1c6   :  { %v291_v29 = vpop.permute.xlu0 %290 }
 0x1c7   :  { %v2767_v30 = vadd.f32 %v291_v29, %v283_v28 }
 0x1c9   :  { %2493 = vtanh.f32 %v2767_v30  ;;  %v2923_v28 = vsel %vm407_vm3, %v2767_v30, 0.0 }
 0x1d6   :  { %v2494_v42 = vpop.eup %2493 }
 0x1d7   :  { %296 = vrot.lane.b32.xlu1 %v2494_v42, %s2633_s11 }
 0x249   :  { %v297_v47 = vpop.permute.xlu1 %296 }
 0x24a   :  { %v299_v48 = vmul.f32 %v2492_v25, %v297_v47  ;;  %v619_v25 = vsel %vm412_vm5, 1, %v2632_v11  ;;  %vm2019_vm5 = vcmask 31744  }
 0x24c   :  { %301 = vrot.lane.b32.xlu0 %v299_v48, %s2634_s12  ;;  %v2859_v49 = vsel %vm407_vm3, %v299_v48, 0.0 }
 0x24d   :  { %414 = vrot.lane.b32.xlu1 %v2859_v49, %s2634_s12 }
 0x2be   :  { %v302_v50 = vpop.permute.xlu0 %301 }
 0x2bf   :  { %v304_v51 = vsel %vm71_vm1, %v302_v50, 0.0  ;;  %v415_v52 = vpop.permute.xlu1 %414 }
 0x2c0   :  { %2249 = vmatmul.mubr.msk.f32.vlgmr.msra.gmra.mxu0 %vm305_vm4, %v304_v51  ;;  %2260 = vmatmul.mubr.msk.f32.vlgmr.msra.gmra.mxu1 %vm71_vm1, %v415_v52 }
 0x2c1   :  { %2263 = vmatpush3.msra.mxu1 %v2779_v33  ;;  %2282 = vmatpush3.msra.mxu0 %v2695_v3 }
 0x2c2   :  { %2264 = vmatprep.subr.mxu1 %v2630_v2  ;;  %2283 = vmatprep.subr.mxu0 %v2630_v2 }
 0x2c3   :  { %2265 = vmatpush3.msra.mxu1 %v2785_v34  ;;  %2284 = vmatpush3.msra.mxu0 %v2703_v4 }
 0x2c4   :  { %2266 = vmatprep.subr.mxu1 %v2630_v2  ;;  %2278 = vmatprep.mubr.msk.f32.mxu1 %vm2631_vm0, %v2630_v2 }
 0x2c5   :  { %2267 = vmatpush3.msra.mxu1 %v2796_v36  ;;  %2285 = vmatprep.subr.mxu0 %v2630_v2 }
 0x2c6   :  { %2268 = vmatprep.subr.mxu1 %v2630_v2  ;;  %2286 = vmatpush3.msra.mxu0 %v2716_v7 }
 0x2c7   :  { %2269 = vmatpush3.msra.mxu1 %v2807_v38  ;;  %2287 = vmatprep.subr.mxu0 %v2630_v2 }
 0x2c8   :  { %2270 = vmatprep.subr.mxu1 %v2630_v2  ;;  %2288 = vmatpush3.msra.mxu0 %v2726_v9 }
 0x2c9   :  { %2271 = vmatpush3.msra.mxu1 %v2818_v40  ;;  %2289 = vmatprep.mubr.msk.f32.mxu0 %vm2631_vm0, %v2630_v2 }
 0x2ca   :  { %2272 = vmatprep.subr.mxu1 %v2630_v2  ;;  %2292 = vmatprep.subr.mxu0 %v2630_v2 }
 0x2cb   :  { %2273 = vmatpush3.msra.mxu1 %v2829_v43 }
 0x2cc   :  { %2274 = vmatprep.subr.mxu1 %v2630_v2 }
 0x2cd   :  { %2275 = vmatpush3.msra.mxu1 %v2838_v44 }
 0x2ce   :  { %2276 = vmatprep.subr.mxu1 %v2630_v2 }
 0x2cf   :  { %2277 = vmatpush3.msra.mxu1 %v2847_v45 }
 0x2d0   :  { %2311 = vmatprep.subr.mxu1 %v2630_v2 }
 0x380   :  { %v375_v61 = vpop.f32.mrf.mxu0  ;;  %v484_v62 = vpop.f32.mrf.mxu1 }
 0x381   :  { %v376_v63 = vadd.f32 %v2909_v59, %v375_v61  ;;  %v488_v0 = vadd.f32 %v484_v62, %v168_v60 }
 0x382   :  { %v2250_v1 = vpop.f32.mrf.mxu0  ;;  %v2261_v5 = vpop.f32.mrf.mxu1 }
 0x383   :  { %2495 = vtanh.f32 %v376_v63  ;;  %v2037_v10 = vmul.f32 -1.442695, %v376_v63  ;;  %v2039_v13 = vmul.f32 -1.442695, %v488_v0 }
 0x384   :  { %2497 = vtanh.f32 %v488_v0  ;;  %v173_v0 = vadd.f32 %v2762_v16, %v2896_v54 }
 0x385   :  { %2499 = vpow2.f32 %v2037_v10 }
 0x386   :  { %2501 = vpow2.f32 %v2039_v13 }
 0x390   :  { %v2496_v6 = vpop.eup %2495 }
 0x391   :  { %v2498_v8 = vpop.eup %2497  ;;  %388 = vrot.lane.b32.xlu0 %v2496_v6, %s2633_s11 }
 0x392   :  { %498 = vrot.lane.b32.xlu1 %v2498_v8, %s2633_s11  ;;  %v2500_v14 = vpop.eup %2499 }
 0x393   :  { %v2502_v15 = vpop.eup %2501  ;;  %v382_v17 = vadd.f32 1.0, %v2500_v14 }
 0x394   :  { %v492_v18 = vadd.f32 1.0, %v2502_v15 }
 0x395   :  { %2503 = vrcp.f32 %v382_v17 }
 0x396   :  { %2505 = vrcp.f32 %v492_v18 }
 0x3a2   :  { %v2504_v19 = vpop.eup %2503 }
 0x3a3   :  { %v2506_v21 = vpop.eup %2505  ;;  %v386_v26 = vmul.f32 0.0, %v2504_v19 }
 0x3a4   :  { %v496_v32 = vmul.f32 %v2506_v21, %v2923_v28 }
 0x403   :  { %v389_v20 = vpop.permute.xlu0 %388 }
 0x404   :  { %v391_v22 = vmul.f32 %v2504_v19, %v389_v20  ;;  %v499_v23 = vpop.permute.xlu1 %498 }
 0x405   :  { %v501_v24 = vmul.f32 %v2506_v21, %v499_v23 }
 0x406   :  { %393 = vrot.lane.b32.xlu0 %v391_v22, %s2634_s12 }
 0x407   :  { %503 = vrot.lane.b32.xlu1 %v501_v24, %s2634_s12 }
 0x40a   :  { %621 = vperm.xlu0 %2486, %v619_v25  }
 0x478   :  { %v394_v27 = vpop.permute.xlu0 %393 }
 0x479   :  { %v2925_v29 = vadd.f32 %v394_v27, %v386_v26  ;;  %v504_v31 = vpop.permute.xlu1 %503  ;;  %v835_v26 = vsel %vm628_vm7, 1, %v2632_v11 }
 0x47a   :  { %v2929_v35 = vadd.f32 %v504_v31, %v496_v32 }
 0x47b   :  { %2507 = vtanh.f32 %v2925_v29  ;;  %v2994_v27 = vsel %vm407_vm3, %v2925_v29, 0.0 }
 0x47c   :  { %2509 = vtanh.f32 %v2929_v35 }
 0x485   :  { %v2940_v50 = vpop.permute.xlu0 %621 }
 0x486   :  { %vm623_vm6 = vcmp.eq.s32.totalorder %v2940_v50, 1 }
 0x488   :  { %v2508_v37 = vpop.eup %2507 }
 0x489   :  { %399 = vrot.lane.b32.xlu1 %v2508_v37, %s2633_s11  ;;  %v2510_v39 = vpop.eup %2509 }
 0x48d   :  { %509 = vrot.lane.b32.xlu1 %v2510_v39, %s2633_s11  ;;  %v3003_v39 = vsel %vm623_vm6, %v2929_v35, %v2923_v28 }
 0x4fb   :  { %v400_v41 = vpop.permute.xlu1 %399 }
 0x4fc   :  { %v402_v30 = vmul.f32 %v2504_v19, %v400_v41 }
 0x4fe   :  { %v2936_v42 = vsel %vm407_vm3, %v402_v30, 0.0 }
 0x4ff   :  { %518 = vrot.lane.b32.xlu1 %v2936_v42, %s2633_s11  ;;  %v510_v47 = vpop.permute.xlu1 %509 }
 0x500   :  { %v512_v48 = vmul.f32 %v2506_v21, %v510_v47 }
 0x502   :  { %514 = vrot.lane.b32.xlu0 %v512_v48, %s2634_s12  ;;  %v2947_v51 = vsel %vm623_vm6, %v512_v48, %v2859_v49 }
 0x506   :  { %630 = vrot.lane.b32.xlu0 %v2947_v51, %s2634_s12 }
 0x571   :  { %v519_v52 = vpop.permute.xlu1 %518 }
 0x574   :  { %v515_v60 = vpop.permute.xlu0 %514 }
 0x575   :  { %v521_v61 = vsel %vm71_vm1, %v515_v60, %v519_v52 }
 0x576   :  { %2279 = vmatmul.mubr.msk.f32.vlgmr.msra.gmra.mxu1 %vm305_vm4, %v521_v61 }
 0x577   :  { %2312 = vmatpush3.msra.mxu1 %v2695_v3  ;;  %2319 = vmatprep.mubr.msk.f32.mxu1 %vm2631_vm0, %v2630_v2 }
 0x578   :  { %v631_v62 = vpop.permute.xlu0 %630  ;;  %2313 = vmatprep.subr.mxu1 %v2630_v2 }
 0x579   :  { %2290 = vmatmul.mubr.msk.f32.vlgmr.msra.gmra.mxu0 %vm71_vm1, %v631_v62  ;;  %2314 = vmatpush3.msra.mxu1 %v2703_v4 }
 0x57a   :  { %2293 = vmatpush3.msra.mxu0 %v2779_v33  ;;  %2308 = vmatprep.mubr.msk.f32.mxu0 %vm2631_vm0, %v2630_v2 }
 0x57b   :  { %2294 = vmatprep.subr.mxu0 %v2630_v2  ;;  %2315 = vmatprep.subr.mxu1 %v2630_v2 }
 0x57c   :  { %2295 = vmatpush3.msra.mxu0 %v2785_v34  ;;  %2316 = vmatpush3.msra.mxu1 %v2716_v7 }
 0x57d   :  { %2296 = vmatprep.subr.mxu0 %v2630_v2  ;;  %2317 = vmatprep.subr.mxu1 %v2630_v2 }
 0x57e   :  { %2297 = vmatpush3.msra.mxu0 %v2796_v36  ;;  %2318 = vmatpush3.msra.mxu1 %v2726_v9 }
 0x57f   :  { %2298 = vmatprep.subr.mxu0 %v2630_v2  ;;  %2322 = vmatprep.subr.mxu1 %v2630_v2 }
 0x580   :  { %2299 = vmatpush3.msra.mxu0 %v2807_v38 }
 0x581   :  { %2300 = vmatprep.subr.mxu0 %v2630_v2 }
 0x582   :  { %2301 = vmatpush3.msra.mxu0 %v2818_v40 }
 0x583   :  { %2302 = vmatprep.subr.mxu0 %v2630_v2 }
 0x584   :  { %2303 = vmatpush3.msra.mxu0 %v2829_v43 }
 0x585   :  { %2304 = vmatprep.subr.mxu0 %v2630_v2 }
 0x586   :  { %2305 = vmatpush3.msra.mxu0 %v2838_v44 }
 0x587   :  { %2306 = vmatprep.subr.mxu0 %v2630_v2 }
 0x588   :  { %2307 = vmatpush3.msra.mxu0 %v2847_v45 }
 0x589   :  { %2341 = vmatprep.subr.mxu0 %v2630_v2 }
 0x636   :  { %v591_v49 = vpop.f32.mrf.mxu1 }
 0x637   :  { %v592_v63 = vadd.f32 %v2909_v59, %v591_v49 }
 0x638   :  { %v2280_v1 = vpop.f32.mrf.mxu1 }
 0x639   :  { %2511 = vtanh.f32 %v592_v63  ;;  %v700_v5 = vpop.f32.mrf.mxu0  ;;  %v2041_v14 = vmul.f32 -1.442695, %v592_v63 }
 0x63a   :  { %v704_v6 = vadd.f32 %v700_v5, %v173_v0  ;;  %v178_v5 = vadd.f32 %v2894_v53, %v2762_v16 }
 0x63b   :  { %v2291_v8 = vpop.f32.mrf.mxu0 }
 0x63c   :  { %2513 = vtanh.f32 %v704_v6  ;;  %v2043_v15 = vmul.f32 -1.442695, %v704_v6 }
 0x63d   :  { %2515 = vpow2.f32 %v2041_v14 }
 0x63e   :  { %2517 = vpow2.f32 %v2043_v15 }
 0x646   :  { %v2512_v10 = vpop.eup %2511 }
 0x647   :  { %604 = vrot.lane.b32.xlu1 %v2512_v10, %s2633_s11 }
 0x649   :  { %v2514_v13 = vpop.eup %2513 }
 0x64a   :  { %714 = vrot.lane.b32.xlu0 %v2514_v13, %s2633_s11  ;;  %v2516_v17 = vpop.eup %2515 }
 0x64b   :  { %v2518_v18 = vpop.eup %2517  ;;  %v598_v19 = vadd.f32 1.0, %v2516_v17 }
 0x64c   :  { %v708_v54 = vadd.f32 1.0, %v2518_v18 }
 0x64d   :  { %2519 = vrcp.f32 %v598_v19 }
 0x64e   :  { %2521 = vrcp.f32 %v708_v54 }
 0x65a   :  { %v2520_v20 = vpop.eup %2519 }
 0x65b   :  { %v2522_v23 = vpop.eup %2521  ;;  %v602_v31 = vmul.f32 %v2520_v20, %v2994_v27 }
 0x65c   :  { %v712_v41 = vmul.f32 %v2522_v23, %v3003_v39 }
 0x6b9   :  { %v605_v21 = vpop.permute.xlu1 %604 }
 0x6ba   :  { %v607_v22 = vmul.f32 %v2520_v20, %v605_v21 }
 0x6bc   :  { %v715_v24 = vpop.permute.xlu0 %714  ;;  %609 = vrot.lane.b32.xlu1 %v607_v22, %s2634_s12 }
 0x6bd   :  { %v717_v25 = vmul.f32 %v2522_v23, %v715_v24 }
 0x6bf   :  { %719 = vrot.lane.b32.xlu0 %v717_v25, %s2634_s12 }
 0x6c0   :  { %837 = vperm.xlu1 %2485, %v835_v26  }
 0x72e   :  { %v610_v32 = vpop.permute.xlu1 %609 }
 0x72f   :  { %v2997_v37 = vadd.f32 %v610_v32, %v602_v31  ;;  %v1051_v31 = vsel %vm844_vm9, 1, %v2632_v11 }
 0x731   :  { %2523 = vtanh.f32 %v2997_v37  ;;  %v720_v30 = vpop.permute.xlu0 %719  ;;  %v3074_v32 = vsel %vm623_vm6, %v2997_v37, %v2994_v27 }
 0x732   :  { %v3007_v47 = vadd.f32 %v720_v30, %v712_v41 }
 0x734   :  { %2525 = vtanh.f32 %v3007_v47 }
 0x73b   :  { %v3012_v48 = vpop.permute.xlu1 %837 }
 0x73c   :  { %vm839_vm8 = vcmp.eq.s32.totalorder %v3012_v48, 1 }
 0x73e   :  { %v2524_v46 = vpop.eup %2523 }
 0x73f   :  { %615 = vrot.lane.b32.xlu0 %v2524_v46, %s2633_s11 }
 0x741   :  { %v2526_v29 = vpop.eup %2525 }
 0x742   :  { %725 = vrot.lane.b32.xlu1 %v2526_v29, %s2633_s11  ;;  %v3083_v29 = vsel %vm839_vm8, %v3007_v47, %v3003_v39 }
 0x7b1   :  { %v616_v52 = vpop.permute.xlu0 %615 }
 0x7b2   :  { %v618_v28 = vmul.f32 %v2520_v20, %v616_v52 }
 0x7b4   :  { %v726_v35 = vpop.permute.xlu1 %725  ;;  %v3017_v60 = vsel %vm623_vm6, %v618_v28, %v2936_v42 }
 0x7b5   :  { %v728_v61 = vmul.f32 %v2522_v23, %v726_v35  ;;  %734 = vrot.lane.b32.xlu1 %v3017_v60, %s2633_s11 }
 0x7b7   :  { %730 = vrot.lane.b32.xlu0 %v728_v61, %s2634_s12  ;;  %v3026_v62 = vsel %vm839_vm8, %v728_v61, %v2947_v51 }
 0x7bb   :  { %846 = vrot.lane.b32.xlu0 %v3026_v62, %s2634_s12 }
 0x827   :  { %v735_v49 = vpop.permute.xlu1 %734 }
 0x829   :  { %v731_v63 = vpop.permute.xlu0 %730 }
 0x82a   :  { %v737_v42 = vsel %vm71_vm1, %v731_v63, %v735_v49 }
 0x82b   :  { %2309 = vmatmul.mubr.msk.f32.vlgmr.msra.gmra.mxu0 %vm305_vm4, %v737_v42 }
 0x82c   :  { %2342 = vmatpush3.msra.mxu0 %v2695_v3  ;;  %2349 = vmatprep.mubr.msk.f32.mxu0 %vm2631_vm0, %v2630_v2 }
 0x82d   :  { %v847_v0 = vpop.permute.xlu0 %846  ;;  %2343 = vmatprep.subr.mxu0 %v2630_v2 }
 0x82e   :  { %2320 = vmatmul.mubr.msk.f32.vlgmr.msra.gmra.mxu1 %vm71_vm1, %v847_v0  ;;  %2344 = vmatpush3.msra.mxu0 %v2703_v4 }
 0x82f   :  { %2323 = vmatpush3.msra.mxu1 %v2779_v33  ;;  %2338 = vmatprep.mubr.msk.f32.mxu1 %vm2631_vm0, %v2630_v2 }
 0x830   :  { %2324 = vmatprep.subr.mxu1 %v2630_v2  ;;  %2345 = vmatprep.subr.mxu0 %v2630_v2 }
 0x831   :  { %2325 = vmatpush3.msra.mxu1 %v2785_v34  ;;  %2346 = vmatpush3.msra.mxu0 %v2716_v7 }
 0x832   :  { %2326 = vmatprep.subr.mxu1 %v2630_v2  ;;  %2347 = vmatprep.subr.mxu0 %v2630_v2 }
 0x833   :  { %2327 = vmatpush3.msra.mxu1 %v2796_v36  ;;  %2348 = vmatpush3.msra.mxu0 %v2726_v9 }
 0x834   :  { %2328 = vmatprep.subr.mxu1 %v2630_v2  ;;  %2352 = vmatprep.subr.mxu0 %v2630_v2 }
 0x835   :  { %2329 = vmatpush3.msra.mxu1 %v2807_v38 }
 0x836   :  { %2330 = vmatprep.subr.mxu1 %v2630_v2 }
 0x837   :  { %2331 = vmatpush3.msra.mxu1 %v2818_v40 }
 0x838   :  { %2332 = vmatprep.subr.mxu1 %v2630_v2 }
 0x839   :  { %2333 = vmatpush3.msra.mxu1 %v2829_v43 }
 0x83a   :  { %2334 = vmatprep.subr.mxu1 %v2630_v2 }
 0x83b   :  { %2335 = vmatpush3.msra.mxu1 %v2838_v44 }
 0x83c   :  { %2336 = vmatprep.subr.mxu1 %v2630_v2 }
 0x83d   :  { %2337 = vmatpush3.msra.mxu1 %v2847_v45 }
 0x83e   :  { %2371 = vmatprep.subr.mxu1 %v2630_v2 }
 0x8eb   :  { %v807_v51 = vpop.f32.mrf.mxu0 }
 0x8ec   :  { %v808_v1 = vadd.f32 %v2909_v59, %v807_v51 }
 0x8ed   :  { %v2310_v6 = vpop.f32.mrf.mxu0 }
 0x8ee   :  { %2527 = vtanh.f32 %v808_v1  ;;  %v916_v8 = vpop.f32.mrf.mxu1  ;;  %v2045_v17 = vmul.f32 -1.442695, %v808_v1  ;;  %v183_v6 = vadd.f32 %v2762_v16, %v2900_v56 }
 0x8ef   :  { %v920_v10 = vadd.f32 %v916_v8, %v178_v5 }
 0x8f0   :  { %v2321_v13 = vpop.f32.mrf.mxu1 }
 0x8f1   :  { %2529 = vtanh.f32 %v920_v10  ;;  %v2047_v18 = vmul.f32 -1.442695, %v920_v10 }
 0x8f2   :  { %2531 = vpow2.f32 %v2045_v17 }
 0x8f3   :  { %2533 = vpow2.f32 %v2047_v18 }
 0x8fb   :  { %v2528_v14 = vpop.eup %2527 }
 0x8fc   :  { %820 = vrot.lane.b32.xlu1 %v2528_v14, %s2633_s11 }
 0x8fe   :  { %v2530_v15 = vpop.eup %2529 }
 0x8ff   :  { %930 = vrot.lane.b32.xlu0 %v2530_v15, %s2633_s11  ;;  %v2532_v19 = vpop.eup %2531 }
 0x900   :  { %v2534_v54 = vpop.eup %2533  ;;  %v814_v20 = vadd.f32 1.0, %v2532_v19 }
 0x901   :  { %v924_v53 = vadd.f32 1.0, %v2534_v54 }
 0x902   :  { %2535 = vrcp.f32 %v814_v20 }
 0x903   :  { %2537 = vrcp.f32 %v924_v53 }
 0x90f   :  { %v2536_v21 = vpop.eup %2535 }
 0x910   :  { %v2538_v24 = vpop.eup %2537  ;;  %v818_v41 = vmul.f32 %v2536_v21, %v3074_v32 }
 0x911   :  { %v928_v52 = vmul.f32 %v2538_v24, %v3083_v29 }
 0x96e   :  { %v821_v22 = vpop.permute.xlu1 %820 }
 0x96f   :  { %v823_v23 = vmul.f32 %v2536_v21, %v821_v22 }
 0x971   :  { %825 = vrot.lane.b32.xlu1 %v823_v23, %s2634_s12  ;;  %v931_v25 = vpop.permute.xlu0 %930 }
 0x972   :  { %v933_v26 = vmul.f32 %v2538_v24, %v931_v25 }
 0x974   :  { %935 = vrot.lane.b32.xlu0 %v933_v26, %s2634_s12 }
 0x975   :  { %1053 = vperm.xlu1 %2485, %v1051_v31   ;;  %v1267_v31 = vsel %vm1060_vm11, 1, %v2632_v11 }
 0x9e3   :  { %v826_v30 = vpop.permute.xlu1 %825 }
 0x9e4   :  { %v3077_v46 = vadd.f32 %v826_v30, %v818_v41 }
 0x9e6   :  { %2539 = vtanh.f32 %v3077_v46  ;;  %v936_v28 = vpop.permute.xlu0 %935  ;;  %v3154_v41 = vsel %vm839_vm8, %v3077_v46, %v3074_v32 }
 0x9e7   :  { %v3087_v35 = vadd.f32 %v936_v28, %v928_v52 }
 0x9e9   :  { %2541 = vtanh.f32 %v3087_v35 }
 0x9f0   :  { %v3092_v37 = vpop.permute.xlu1 %1053 }
 0x9f1   :  { %vm1055_vm10 = vcmp.eq.s32.totalorder %v3092_v37, 1 }
 0x9f3   :  { %v2540_v50 = vpop.eup %2539 }
 0x9f4   :  { %831 = vrot.lane.b32.xlu0 %v2540_v50, %s2633_s11  ;;  %v3163_v50 = vsel %vm1055_vm10, %v3087_v35, %v3083_v29 }
 0x9f6   :  { %v2542_v27 = vpop.eup %2541 }
 0x9f7   :  { %941 = vrot.lane.b32.xlu1 %v2542_v27, %s2633_s11 }
 0xa66   :  { %v832_v61 = vpop.permute.xlu0 %831 }
 0xa67   :  { %v834_v39 = vmul.f32 %v2536_v21, %v832_v61 }
 0xa69   :  { %v942_v47 = vpop.permute.xlu1 %941  ;;  %v3097_v49 = vsel %vm839_vm8, %v834_v39, %v3017_v60 }
 0xa6a   :  { %v944_v63 = vmul.f32 %v2538_v24, %v942_v47  ;;  %950 = vrot.lane.b32.xlu1 %v3097_v49, %s2633_s11 }
 0xa6c   :  { %946 = vrot.lane.b32.xlu0 %v944_v63, %s2634_s12  ;;  %v3106_v42 = vsel %vm1055_vm10, %v944_v63, %v3026_v62 }
 0xa70   :  { %1062 = vrot.lane.b32.xlu0 %v3106_v42, %s2634_s12 }
 0xadc   :  { %v951_v0 = vpop.permute.xlu1 %950 }
 0xade   :  { %v947_v51 = vpop.permute.xlu0 %946 }
 0xadf   :  { %v953_v60 = vsel %vm71_vm1, %v947_v51, %v951_v0 }
 0xae0   :  { %2339 = vmatmul.mubr.msk.f32.vlgmr.msra.gmra.mxu1 %vm305_vm4, %v953_v60 }
 0xae1   :  { %2372 = vmatpush3.msra.mxu1 %v2695_v3  ;;  %2379 = vmatprep.mubr.msk.f32.mxu1 %vm2631_vm0, %v2630_v2 }
 0xae2   :  { %v1063_v1 = vpop.permute.xlu0 %1062  ;;  %2373 = vmatprep.subr.mxu1 %v2630_v2 }
 0xae3   :  { %2350 = vmatmul.mubr.msk.f32.vlgmr.msra.gmra.mxu0 %vm71_vm1, %v1063_v1  ;;  %2374 = vmatpush3.msra.mxu1 %v2703_v4 }
 0xae4   :  { %2353 = vmatpush3.msra.mxu0 %v2779_v33  ;;  %2368 = vmatprep.mubr.msk.f32.mxu0 %vm2631_vm0, %v2630_v2 }
 0xae5   :  { %2354 = vmatprep.subr.mxu0 %v2630_v2  ;;  %2375 = vmatprep.subr.mxu1 %v2630_v2 }
 0xae6   :  { %2355 = vmatpush3.msra.mxu0 %v2785_v34  ;;  %2376 = vmatpush3.msra.mxu1 %v2716_v7 }
 0xae7   :  { %2356 = vmatprep.subr.mxu0 %v2630_v2  ;;  %2377 = vmatprep.subr.mxu1 %v2630_v2 }
 0xae8   :  { %2357 = vmatpush3.msra.mxu0 %v2796_v36  ;;  %2378 = vmatpush3.msra.mxu1 %v2726_v9 }
 0xae9   :  { %2358 = vmatprep.subr.mxu0 %v2630_v2  ;;  %2382 = vmatprep.subr.mxu1 %v2630_v2 }
 0xaea   :  { %2359 = vmatpush3.msra.mxu0 %v2807_v38 }
 0xaeb   :  { %2360 = vmatprep.subr.mxu0 %v2630_v2 }
 0xaec   :  { %2361 = vmatpush3.msra.mxu0 %v2818_v40 }
 0xaed   :  { %2362 = vmatprep.subr.mxu0 %v2630_v2 }
 0xaee   :  { %2363 = vmatpush3.msra.mxu0 %v2829_v43 }
 0xaef   :  { %2364 = vmatprep.subr.mxu0 %v2630_v2 }
 0xaf0   :  { %2365 = vmatpush3.msra.mxu0 %v2838_v44 }
 0xaf1   :  { %2366 = vmatprep.subr.mxu0 %v2630_v2 }
 0xaf2   :  { %2367 = vmatpush3.msra.mxu0 %v2847_v45 }
 0xaf3   :  { %2401 = vmatprep.subr.mxu0 %v2630_v2 }
 0xba0   :  { %v1023_v62 = vpop.f32.mrf.mxu1 }
 0xba1   :  { %v1024_v5 = vadd.f32 %v2909_v59, %v1023_v62 }
 0xba2   :  { %v2340_v8 = vpop.f32.mrf.mxu1 }
 0xba3   :  { %2543 = vtanh.f32 %v1024_v5  ;;  %v1132_v10 = vpop.f32.mrf.mxu0  ;;  %v2049_v18 = vmul.f32 -1.442695, %v1024_v5 }
 0xba4   :  { %v1136_v13 = vadd.f32 %v1132_v10, %v183_v6 }
 0xba5   :  { %v2351_v14 = vpop.f32.mrf.mxu0 }
 0xba6   :  { %2545 = vtanh.f32 %v1136_v13  ;;  %v2051_v19 = vmul.f32 -1.442695, %v1136_v13 }
 0xba7   :  { %2547 = vpow2.f32 %v2049_v18 }
 0xba8   :  { %2549 = vpow2.f32 %v2051_v19  ;;  %v1483_v19 = vsel %vm1276_vm13, 1, %v2632_v11 }
 0xbb0   :  { %v2544_v15 = vpop.eup %2543 }
 0xbb1   :  { %1036 = vrot.lane.b32.xlu1 %v2544_v15, %s2633_s11 }
 0xbb3   :  { %v2546_v17 = vpop.eup %2545 }
 0xbb4   :  { %1146 = vrot.lane.b32.xlu0 %v2546_v17, %s2633_s11  ;;  %v2548_v54 = vpop.eup %2547 }
 0xbb5   :  { %v2550_v20 = vpop.eup %2549  ;;  %v1030_v53 = vadd.f32 1.0, %v2548_v54 }
 0xbb6   :  { %v1140_v56 = vadd.f32 1.0, %v2550_v20 }
 0xbb7   :  { %2551 = vrcp.f32 %v1030_v53 }
 0xbb8   :  { %2553 = vrcp.f32 %v1140_v56 }
 0xbc4   :  { %v2552_v21 = vpop.eup %2551 }
 0xbc5   :  { %v2554_v24 = vpop.eup %2553  ;;  %v1034_v30 = vmul.f32 %v2552_v21, %v3154_v41 }
 0xbc6   :  { %v1144_v27 = vmul.f32 %v2554_v24, %v3163_v50 }
 0xc23   :  { %v1037_v22 = vpop.permute.xlu1 %1036 }
 0xc24   :  { %v1039_v23 = vmul.f32 %v2552_v21, %v1037_v22 }
 0xc26   :  { %v1147_v25 = vpop.permute.xlu0 %1146  ;;  %1041 = vrot.lane.b32.xlu1 %v1039_v23, %s2634_s12 }
 0xc27   :  { %v1149_v26 = vmul.f32 %v2554_v24, %v1147_v25 }
 0xc29   :  { %1151 = vrot.lane.b32.xlu0 %v1149_v26, %s2634_s12 }
 0xc2a   :  { %1269 = vperm.xlu1 %2485, %v1267_v31  }
 0xc98   :  { %v1042_v52 = vpop.permute.xlu1 %1041 }
 0xc99   :  { %v3157_v28 = vadd.f32 %v1042_v52, %v1034_v30 }
 0xc9b   :  { %2555 = vtanh.f32 %v3157_v28  ;;  %v1152_v61 = vpop.permute.xlu0 %1151  ;;  %v3234_v54 = vsel %vm1055_vm10, %v3157_v28, %v3154_v41 }
 0xc9c   :  { %v3167_v39 = vadd.f32 %v1152_v61, %v1144_v27 }
 0xc9e   :  { %2557 = vtanh.f32 %v3167_v39 }
 0xca5   :  { %v3172_v46 = vpop.permute.xlu1 %1269 }
 0xca6   :  { %vm1271_vm12 = vcmp.eq.s32.totalorder %v3172_v46, 1 }
 0xca7   :  { %v3243_v56 = vsel %vm1271_vm12, %v3167_v39, %v3163_v50  ;;  %v2615_v39 = vld [vmem:[%s3503_s3 + $0x18] sm:$0xff] }
 0xca8   :  { %v2556_v48 = vpop.eup %2555 }
 0xca9   :  { %1047 = vrot.lane.b32.xlu0 %v2556_v48, %s2633_s11 }
 0xcab   :  { %v2558_v32 = vpop.eup %2557 }
 0xcac   :  { %1157 = vrot.lane.b32.xlu1 %v2558_v32, %s2633_s11  ;;  %v2616_v32 = vld [vmem:[%s3503_s3 + $0x10] sm:$0xff] }
 0xd1b   :  { %v1048_v47 = vpop.permute.xlu0 %1047 }
 0xd1c   :  { %v1050_v29 = vmul.f32 %v2552_v21, %v1048_v47  ;;  %v3285_v47 = vld [vmem:[%s3507_s5 + $0x38] sm:$0xff] }
 0xd1e   :  { %v1158_v35 = vpop.permute.xlu1 %1157  ;;  %v3177_v63 = vsel %vm1055_vm10, %v1050_v29, %v3097_v49  ;;  %v3295_v29 = vld [vmem:[%s3507_s5 + $0x30] sm:$0xff] }
 0xd1f   :  { %v1160_v0 = vmul.f32 %v2554_v24, %v1158_v35  ;;  %1166 = vrot.lane.b32.xlu1 %v3177_v63, %s2633_s11  ;;  %v2619_v35 = vld [vmem:[%s3503_s3 + $0x8] sm:$0xff] }
 0xd21   :  { %1162 = vrot.lane.b32.xlu0 %v1160_v0, %s2634_s12  ;;  %v3186_v51 = vsel %vm1271_vm12, %v1160_v0, %v3106_v42  ;;  %v2621_v0 = vld [vmem:[%s3503_s3] sm:$0xff] }
 0xd25   :  { %1278 = vrot.lane.b32.xlu0 %v3186_v51, %s2634_s12 }
 0xd91   :  { %v1167_v60 = vpop.permute.xlu1 %1166 }
 0xd93   :  { %v1163_v1 = vpop.permute.xlu0 %1162 }
 0xd94   :  { %v1169_v49 = vsel %vm71_vm1, %v1163_v1, %v1167_v60  ;;  %v3324_v60 = vld [vmem:[%s3507_s5 + $0x18] sm:$0xff] }
 0xd95   :  { %2369 = vmatmul.mubr.msk.f32.vlgmr.msra.gmra.mxu0 %vm305_vm4, %v1169_v49 }
 0xd96   :  { %2402 = vmatpush3.msra.mxu0 %v2695_v3  ;;  %2409 = vmatprep.mubr.msk.f32.mxu0 %vm2631_vm0, %v2630_v2 }
 0xd97   :  { %v1279_v62 = vpop.permute.xlu0 %1278  ;;  %2403 = vmatprep.subr.mxu0 %v2630_v2 }
 0xd98   :  { %2380 = vmatmul.mubr.msk.f32.vlgmr.msra.gmra.mxu1 %vm71_vm1, %v1279_v62  ;;  %2404 = vmatpush3.msra.mxu0 %v2703_v4  ;;  %v3338_v62 = vld [vmem:[%s3506_s4] ss:$0 sm:$0xff] }
 0xd99   :  { %2383 = vmatpush3.msra.mxu1 %v2779_v33  ;;  %2398 = vmatprep.mubr.msk.f32.mxu1 %vm2631_vm0, %v2630_v2 }
 0xd9a   :  { %2384 = vmatprep.subr.mxu1 %v2630_v2  ;;  %2405 = vmatprep.subr.mxu0 %v2630_v2 }
 0xd9b   :  { %2385 = vmatpush3.msra.mxu1 %v2785_v34  ;;  %2406 = vmatpush3.msra.mxu0 %v2716_v7  ;;  %v188_v7 = vadd.f32 %v2898_v55, %v2762_v16 }
 0xd9c   :  { %2386 = vmatprep.subr.mxu1 %v2630_v2  ;;  %2407 = vmatprep.subr.mxu0 %v2630_v2 }
 0xd9d   :  { %2387 = vmatpush3.msra.mxu1 %v2796_v36  ;;  %2408 = vmatpush3.msra.mxu0 %v2726_v9 }
 0xd9e   :  { %2388 = vmatprep.subr.mxu1 %v2630_v2  ;;  %2412 = vmatprep.subr.mxu0 %v2630_v2 }
 0xd9f   :  { %2389 = vmatpush3.msra.mxu1 %v2807_v38 }
 0xda0   :  { %2390 = vmatprep.subr.mxu1 %v2630_v2 }
 0xda1   :  { %2391 = vmatpush3.msra.mxu1 %v2818_v40 }
 0xda2   :  { %2392 = vmatprep.subr.mxu1 %v2630_v2 }
 0xda3   :  { %2393 = vmatpush3.msra.mxu1 %v2829_v43 }
 0xda4   :  { %2394 = vmatprep.subr.mxu1 %v2630_v2 }
 0xda5   :  { %2395 = vmatpush3.msra.mxu1 %v2838_v44 }
 0xda6   :  { %2396 = vmatprep.subr.mxu1 %v2630_v2 }
 0xda7   :  { %2397 = vmatpush3.msra.mxu1 %v2847_v45 }
 0xda8   :  { %2431 = vmatprep.subr.mxu1 %v2630_v2 }
 0xe55   :  { %v1239_v3 = vpop.f32.mrf.mxu0 }
 0xe56   :  { %v1240_v4 = vadd.f32 %v2909_v59, %v1239_v3 }
 0xe57   :  { %v2370_v9 = vpop.f32.mrf.mxu0 }
 0xe58   :  { %2559 = vtanh.f32 %v1240_v4  ;;  %v1348_v33 = vpop.f32.mrf.mxu1  ;;  %v2053_v42 = vmul.f32 -1.442695, %v1240_v4 }
 0xe59   :  { %v1352_v34 = vadd.f32 %v1348_v33, %v188_v7 }
 0xe5a   :  { %v2381_v36 = vpop.f32.mrf.mxu1 }
 0xe5b   :  { %2561 = vtanh.f32 %v1352_v34  ;;  %v2055_v5 = vmul.f32 -1.442695, %v1352_v34 }
 0xe5c   :  { %2563 = vpow2.f32 %v2053_v42 }
 0xe5d   :  { %2565 = vpow2.f32 %v2055_v5 }
 0xe65   :  { %v2560_v38 = vpop.eup %2559 }
 0xe66   :  { %1252 = vrot.lane.b32.xlu1 %v2560_v38, %s2633_s11 }
 0xe68   :  { %v2562_v40 = vpop.eup %2561 }
 0xe69   :  { %1362 = vrot.lane.b32.xlu0 %v2562_v40, %s2633_s11  ;;  %v2564_v6 = vpop.eup %2563 }
 0xe6a   :  { %v2566_v8 = vpop.eup %2565  ;;  %v1246_v10 = vadd.f32 1.0, %v2564_v6  ;;  %v3347_v6 = vld [vmem:[%s3505_s1] sm:$0xff] }
 0xe6b   :  { %v1356_v16 = vadd.f32 1.0, %v2566_v8  ;;  %vm1492_vm15 = vcmp.gt.s32.totalorder %v3347_v6, 6 }
 0xe6c   :  { %2567 = vrcp.f32 %v1246_v10 }
 0xe6d   :  { %2569 = vrcp.f32 %v1356_v16 }
 0xe79   :  { %v2568_v55 = vpop.eup %2567 }
 0xe7a   :  { %v2570_v15 = vpop.eup %2569  ;;  %v1250_v20 = vmul.f32 %v2568_v55, %v3234_v54 }
 0xe7b   :  { %v1360_v21 = vmul.f32 %v2570_v15, %v3243_v56 }
 0xed8   :  { %v1253_v13 = vpop.permute.xlu1 %1252 }
 0xed9   :  { %v1255_v14 = vmul.f32 %v2568_v55, %v1253_v13 }
 0xedb   :  { %1257 = vrot.lane.b32.xlu1 %v1255_v14, %s2634_s12  ;;  %v1363_v17 = vpop.permute.xlu0 %1362 }
 0xedc   :  { %v1365_v18 = vmul.f32 %v2570_v15, %v1363_v17 }
 0xede   :  { %1367 = vrot.lane.b32.xlu0 %v1365_v18, %s2634_s12 }
 0xedf   :  { %1485 = vperm.xlu1 %2485, %v1483_v19  }
 0xf4d   :  { %v1258_v53 = vpop.permute.xlu1 %1257 }
 0xf4e   :  { %v3237_v12 = vadd.f32 %v1258_v53, %v1250_v20 }
 0xf50   :  { %2571 = vtanh.f32 %v3237_v12  ;;  %v1368_v22 = vpop.permute.xlu0 %1367  ;;  %v3357_v13 = vsel %vm1271_vm12, %v3237_v12, %v3234_v54 }
 0xf51   :  { %v3247_v23 = vadd.f32 %v1368_v22, %v1360_v21 }
 0xf53   :  { %2573 = vtanh.f32 %v3247_v23 }
 0xf5a   :  { %v3252_v25 = vpop.permute.xlu1 %1485 }
 0xf5b   :  { %vm1487_vm14 = vcmp.eq.s32.totalorder %v3252_v25, 1 }
 0xf5c   :  { %v3366_v18 = vsel %vm1487_vm14, %v3247_v23, %v3243_v56 }
 0xf5d   :  { %v2572_v37 = vpop.eup %2571 }
 0xf5e   :  { %1263 = vrot.lane.b32.xlu0 %v2572_v37, %s2633_s11 }
 0xf60   :  { %v2574_v24 = vpop.eup %2573 }
 0xf61   :  { %1373 = vrot.lane.b32.xlu1 %v2574_v24, %s2633_s11 }
 0xfd0   :  { %v1264_v26 = vpop.permute.xlu0 %1263 }
 0xfd1   :  { %v1266_v31 = vmul.f32 %v2568_v55, %v1264_v26  ;;  %v1699_v55 = vsel %vm1492_vm15, 1, %v2632_v11 }
 0xfd3   :  { %v1374_v41 = vpop.permute.xlu1 %1373  ;;  %v3257_v30 = vsel %vm1271_vm12, %v1266_v31, %v3177_v63  ;;  %v3306_v63 = vld [vmem:[%s3507_s5 + $0x28] sm:$0xff] }
 0xfd4   :  { %v1376_v52 = vmul.f32 %v2570_v15, %v1374_v41  ;;  %1382 = vrot.lane.b32.xlu1 %v3257_v30, %s2633_s11 }
 0xfd6   :  { %1378 = vrot.lane.b32.xlu0 %v1376_v52, %s2634_s12  ;;  %v3266_v28 = vsel %vm1487_vm14, %v1376_v52, %v3186_v51  ;;  %v3317_v51 = vld [vmem:[%s3507_s5 + $0x20] sm:$0xff]  ;;  %v2626_v52 = vld [vmem:[%s3507_s5 + $0x10] sm:$0xff] }
 0xfda   :  { %1494 = vrot.lane.b32.xlu0 %v3266_v28, %s2634_s12 }
0x1046   :  { %v1383_v50 = vpop.permute.xlu1 %1382 }
0x1048   :  { %v1379_v27 = vpop.permute.xlu0 %1378 }
0x1049   :  { %v1385_v61 = vsel %vm71_vm1, %v1379_v27, %v1383_v50  ;;  %v2628_v50 = vld [vmem:[%s3507_s5] sm:$0xff] }
0x104a   :  { %2399 = vmatmul.mubr.msk.f32.vlgmr.msra.gmra.mxu1 %vm305_vm4, %v1385_v61  ;;  %v2629_v61 = vld [vmem:[%s3508_s6] ss:$0 sm:$0xff] }
0x104b   :  { %2432 = vmatpush3.msra.mxu1 %v2615_v39  ;;  %2439 = vmatprep.mubr.msk.f32.mxu1 %vm2631_vm0, %v2630_v2 }
0x104c   :  { %v1495_v48 = vpop.permute.xlu0 %1494  ;;  %2433 = vmatprep.subr.mxu1 %v2630_v2 }
0x104d   :  { %2410 = vmatmul.mubr.msk.f32.vlgmr.msra.gmra.mxu0 %vm71_vm1, %v1495_v48  ;;  %2434 = vmatpush3.msra.mxu1 %v2616_v32  ;;  %v198_v48 = vadd.f32 %v3338_v62, %v2902_v57 }
0x104e   :  { %2413 = vmatpush3.msra.mxu0 %v3285_v47  ;;  %2428 = vmatprep.mubr.msk.f32.mxu0 %vm2631_vm0, %v2630_v2 }
0x104f   :  { %2414 = vmatprep.subr.mxu0 %v2630_v2  ;;  %2435 = vmatprep.subr.mxu1 %v2630_v2 }
0x1050   :  { %2415 = vmatpush3.msra.mxu0 %v3295_v29  ;;  %2436 = vmatpush3.msra.mxu1 %v2619_v35 }
0x1051   :  { %2416 = vmatprep.subr.mxu0 %v2630_v2  ;;  %2437 = vmatprep.subr.mxu1 %v2630_v2 }
0x1052   :  { %2417 = vmatpush3.msra.mxu0 %v3306_v63  ;;  %2438 = vmatpush3.msra.mxu1 %v2621_v0 }
0x1053   :  { %2418 = vmatprep.subr.mxu0 %v2630_v2  ;;  %2442 = vmatprep.subr.mxu1 %v2630_v2 }
0x1054   :  { %2419 = vmatpush3.msra.mxu0 %v3317_v51 }
0x1055   :  { %2420 = vmatprep.subr.mxu0 %v2630_v2 }
0x1056   :  { %2421 = vmatpush3.msra.mxu0 %v3324_v60 }
0x1057   :  { %2422 = vmatprep.subr.mxu0 %v2630_v2 }
0x1058   :  { %2423 = vmatpush3.msra.mxu0 %v2829_v43  ;;  %v193_v43 = vadd.f32 %v3338_v62, %v2904_v58 }
0x1059   :  { %2424 = vmatprep.subr.mxu0 %v2630_v2 }
0x105a   :  { %2425 = vmatpush3.msra.mxu0 %v2838_v44 }
0x105b   :  { %2426 = vmatprep.subr.mxu0 %v2630_v2 }
0x105c   :  { %2427 = vmatpush3.msra.mxu0 %v2847_v45 }
0x105d   :  { %2461 = vmatprep.subr.mxu0 %v2630_v2 }
0x110a   :  { %v1455_v1 = vpop.f32.mrf.mxu1 }
0x110b   :  { %v1456_v49 = vadd.f32 %v2909_v59, %v1455_v1 }
0x110c   :  { %v2400_v3 = vpop.f32.mrf.mxu1 }
0x110d   :  { %2575 = vtanh.f32 %v1456_v49  ;;  %v1564_v44 = vpop.f32.mrf.mxu0  ;;  %v2057_v59 = vmul.f32 -1.442695, %v1456_v49 }
0x110e   :  { %v1568_v4 = vadd.f32 %v1564_v44, %v193_v43 }
0x110f   :  { %v2411_v7 = vpop.f32.mrf.mxu0 }
0x1110   :  { %2577 = vtanh.f32 %v1568_v4  ;;  %v2059_v33 = vmul.f32 -1.442695, %v1568_v4 }
0x1111   :  { %2579 = vpow2.f32 %v2057_v59 }
0x1112   :  { %2581 = vpow2.f32 %v2059_v33 }
0x111a   :  { %v2576_v45 = vpop.eup %2575 }
0x111b   :  { %1468 = vrot.lane.b32.xlu1 %v2576_v45, %s2633_s11 }
0x111d   :  { %v2578_v9 = vpop.eup %2577 }
0x111e   :  { %1578 = vrot.lane.b32.xlu0 %v2578_v9, %s2633_s11  ;;  %v2580_v34 = vpop.eup %2579 }
0x111f   :  { %v2582_v36 = vpop.eup %2581  ;;  %v1462_v38 = vadd.f32 1.0, %v2580_v34 }
0x1120   :  { %v1572_v58 = vadd.f32 1.0, %v2582_v36 }
0x1121   :  { %2583 = vrcp.f32 %v1462_v38 }
0x1122   :  { %2585 = vrcp.f32 %v1572_v58 }
0x112e   :  { %v2584_v40 = vpop.eup %2583 }
0x112f   :  { %v2586_v8 = vpop.eup %2585  ;;  %v1466_v14 = vmul.f32 %v2584_v40, %v3357_v13 }
0x1130   :  { %v1576_v19 = vmul.f32 %v2586_v8, %v3366_v18 }
0x118d   :  { %v1469_v42 = vpop.permute.xlu1 %1468 }
0x118e   :  { %v1471_v5 = vmul.f32 %v2584_v40, %v1469_v42 }
0x1190   :  { %v1579_v10 = vpop.permute.xlu0 %1578  ;;  %1473 = vrot.lane.b32.xlu1 %v1471_v5, %s2634_s12 }
0x1191   :  { %v1581_v16 = vmul.f32 %v2586_v8, %v1579_v10 }
0x1193   :  { %1583 = vrot.lane.b32.xlu0 %v1581_v16, %s2634_s12 }
0x1194   :  { %1701 = vperm.xlu1 %2485, %v1699_v55  }
0x1202   :  { %v1474_v15 = vpop.permute.xlu1 %1473 }
0x1203   :  { %v3360_v17 = vadd.f32 %v1474_v15, %v1466_v14 }
0x1205   :  { %2587 = vtanh.f32 %v3360_v17  ;;  %v1584_v20 = vpop.permute.xlu0 %1583  ;;  %v1491_v9 = vsel %vm1487_vm14, %v3360_v17, %v3357_v13 }
0x1206   :  { %v3370_v53 = vadd.f32 %v1584_v20, %v1576_v19 }
0x1208   :  { %2589 = vtanh.f32 %v3370_v53 }
0x120f   :  { %v3375_v12 = vpop.permute.xlu1 %1701 }
0x1210   :  { %vm1703_vm2 = vcmp.eq.s32.totalorder %v3375_v12, 1  ;;  %v1936_v12 = vld [vmem:[%s3509_s7 + $0x28] sm:$0xff] }
0x1211   :  { %v1705_v36 = vsel %vm1703_vm2, %v3370_v53, %v3366_v18 }
0x1212   :  { %v2588_v46 = vpop.eup %2587 }
0x1213   :  { %1479 = vrot.lane.b32.xlu0 %v2588_v46, %s2633_s11 }
0x1215   :  { %v2590_v54 = vpop.eup %2589 }
0x1216   :  { %1589 = vrot.lane.b32.xlu1 %v2590_v54, %s2633_s11 }
0x1285   :  { %v1480_v21 = vpop.permute.xlu0 %1479 }
0x1286   :  { %v1482_v56 = vmul.f32 %v2584_v40, %v1480_v21 }
0x1288   :  { %v1590_v22 = vpop.permute.xlu1 %1589  ;;  %v3380_v23 = vsel %vm1487_vm14, %v1482_v56, %v3257_v30 }
0x1289   :  { %v1592_v37 = vmul.f32 %v2586_v8, %v1590_v22  ;;  %1598 = vrot.lane.b32.xlu1 %v3380_v23, %s2633_s11 }
0x128b   :  { %1594 = vrot.lane.b32.xlu0 %v1592_v37, %s2634_s12  ;;  %v3389_v24 = vsel %vm1703_vm2, %v1592_v37, %v3266_v28  ;;  %v2627_v28 = vld [vmem:[%s3507_s5 + $0x8] sm:$0xff] }
0x128f   :  { %1710 = vrot.lane.b32.xlu0 %v3389_v24, %s2634_s12 }
0x12fb   :  { %v1599_v26 = vpop.permute.xlu1 %1598 }
0x12fd   :  { %v1595_v31 = vpop.permute.xlu0 %1594 }
0x12fe   :  { %v1601_v41 = vsel %vm71_vm1, %v1595_v31, %v1599_v26 }
0x12ff   :  { %2429 = vmatmul.mubr.msk.f32.vlgmr.msra.gmra.mxu0 %vm305_vm4, %v1601_v41 }
0x1300   :  { %2477 = vmatprep.mubr.msk.f32.mxu0 %vm2631_vm0, %v2630_v2 }
0x1301   :  { %v1711_v30 = vpop.permute.xlu0 %1710 }
0x1302   :  { %2440 = vmatmul.mubr.msk.f32.vlgmr.msra.gmra.mxu1 %vm71_vm1, %v1711_v30  ;;  %v1938_v30 = vld [vmem:[%s3509_s7 + $0x38] sm:$0xff] }
0x1303   :  { %2443 = vmatpush3.msra.mxu1 %v3285_v47  ;;  %2458 = vmatprep.mubr.msk.f32.mxu1 %vm2631_vm0, %v2630_v2  ;;  %vm1708_vm0 = vcmp.gt.s32.totalorder %v3347_v6, 7 }
0x1304   :  { %2444 = vmatprep.subr.mxu1 %v2630_v2  ;;  %v1915_v53 = vsel %vm1708_vm0, 1, %v2632_v11  ;;  %2462 = vmatpush3.msra.mxu0 %v1938_v30 }
0x1305   :  { %2445 = vmatpush3.msra.mxu1 %v3295_v29  ;;  %2463 = vmatprep.subr.mxu0 %v2630_v2 }
0x1306   :  { %2446 = vmatprep.subr.mxu1 %v2630_v2 }
0x1307   :  { %2447 = vmatpush3.msra.mxu1 %v3306_v63 }
0x1308   :  { %2448 = vmatprep.subr.mxu1 %v2630_v2 }
0x1309   :  { %2449 = vmatpush3.msra.mxu1 %v3317_v51 }
0x130a   :  { %2450 = vmatprep.subr.mxu1 %v2630_v2 }
0x130b   :  { %2451 = vmatpush3.msra.mxu1 %v3324_v60 }
0x130c   :  { %2452 = vmatprep.subr.mxu1 %v2630_v2 }
0x130d   :  { %2453 = vmatpush3.msra.mxu1 %v2626_v52  ;;  %v1937_v52 = vld [vmem:[%s3509_s7 + $0x30] sm:$0xff] }
0x130e   :  { %2454 = vmatprep.subr.mxu1 %v2630_v2  ;;  %2464 = vmatpush3.msra.mxu0 %v1937_v52 }
0x130f   :  { %2455 = vmatpush3.msra.mxu1 %v2627_v28  ;;  %2465 = vmatprep.subr.mxu0 %v2630_v2  ;;  %v1934_v28 = vld [vmem:[%s3509_s7 + $0x18] sm:$0xff] }
0x1310   :  { %2456 = vmatprep.subr.mxu1 %v2630_v2  ;;  %2466 = vmatpush3.msra.mxu0 %v1936_v12 }
0x1311   :  { %2457 = vmatpush3.msra.mxu1 %v2628_v50  ;;  %2467 = vmatprep.subr.mxu0 %v2630_v2 }
0x13bf   :  { %v1671_v27 = vpop.f32.mrf.mxu0 }
0x13c0   :  { %v1672_v39 = vadd.f32 %v2629_v61, %v1671_v27  ;;  %v1933_v27 = vld [vmem:[%s3509_s7 + $0x10] sm:$0xff] }
0x13c1   :  { %v2430_v32 = vpop.f32.mrf.mxu0 }
0x13c2   :  { %2591 = vtanh.f32 %v1672_v39  ;;  %v1780_v47 = vpop.f32.mrf.mxu1  ;;  %v2061_v51 = vmul.f32 -1.442695, %v1672_v39  ;;  %v1931_v39 = vld [vmem:[%s3509_s7] sm:$0xff] }
0x13c3   :  { %v1784_v29 = vadd.f32 %v1780_v47, %v198_v48 }
0x13c4   :  { %v2441_v35 = vpop.f32.mrf.mxu1 }
0x13c5   :  { %2593 = vtanh.f32 %v1784_v29  ;;  %v2063_v60 = vmul.f32 -1.442695, %v1784_v29 }
0x13c6   :  { %2595 = vpow2.f32 %v2061_v51 }
0x13c7   :  { %2597 = vpow2.f32 %v2063_v60 }
0x13cf   :  { %v2592_v63 = vpop.eup %2591 }
0x13d0   :  { %1684 = vrot.lane.b32.xlu1 %v2592_v63, %s2633_s11 }
0x13d2   :  { %v2594_v0 = vpop.eup %2593 }
0x13d3   :  { %1794 = vrot.lane.b32.xlu0 %v2594_v0, %s2633_s11  ;;  %v2596_v1 = vpop.eup %2595 }
0x13d4   :  { %v2598_v49 = vpop.eup %2597  ;;  %v1678_v43 = vadd.f32 1.0, %v2596_v1 }
0x13d5   :  { %v1788_v57 = vadd.f32 1.0, %v2598_v49 }
0x13d6   :  { %2599 = vrcp.f32 %v1678_v43 }
0x13d7   :  { %2601 = vrcp.f32 %v1788_v57 }
0x13e3   :  { %v2600_v62 = vpop.eup %2599 }
0x13e4   :  { %v2602_v4 = vpop.eup %2601  ;;  %v1682_v59 = vmul.f32 %v2600_v62, %v1491_v9 }
0x13e5   :  { %v1792_v38 = vmul.f32 %v2602_v4, %v1705_v36 }
0x1442   :  { %v1685_v3 = vpop.permute.xlu1 %1684 }
0x1443   :  { %v1687_v44 = vmul.f32 %v2600_v62, %v1685_v3 }
0x1445   :  { %1689 = vrot.lane.b32.xlu1 %v1687_v44, %s2634_s12  ;;  %v1795_v7 = vpop.permute.xlu0 %1794 }
0x1446   :  { %v1797_v45 = vmul.f32 %v2602_v4, %v1795_v7 }
0x1448   :  { %1799 = vrot.lane.b32.xlu0 %v1797_v45, %s2634_s12 }
0x14b7   :  { %v1690_v33 = vpop.permute.xlu1 %1689 }
0x14b8   :  { %v1692_v34 = vadd.f32 %v1690_v33, %v1682_v59 }
0x14ba   :  { %2603 = vtanh.f32 %v1692_v34  ;;  %v1800_v58 = vpop.permute.xlu0 %1799  ;;  %v1707_v11 = vsel %vm1703_vm2, %v1692_v34, %v1491_v9 }
0x14bb   :  { %v1802_v40 = vadd.f32 %v1800_v58, %v1792_v38 }
0x14bd   :  { %2605 = vtanh.f32 %v1802_v40 }
0x14c7   :  { %v2604_v42 = vpop.eup %2603 }
0x14c8   :  { %1695 = vrot.lane.b32.xlu1 %v2604_v42, %s2633_s11 }
0x14ca   :  { %v2606_v5 = vpop.eup %2605 }
0x14cb   :  { %1805 = vrot.lane.b32.xlu0 %v2606_v5, %s2633_s11 }
0x153a   :  { %v1696_v25 = vpop.permute.xlu1 %1695 }
0x153b   :  { %v1698_v8 = vmul.f32 %v2600_v62, %v1696_v25 }
0x153d   :  { %v1806_v10 = vpop.permute.xlu0 %1805  ;;  %v3443_v16 = vsel %vm1703_vm2, %v1698_v8, %v3380_v23 }
0x153e   :  { %v1808_v55 = vmul.f32 %v2602_v4, %v1806_v10  ;;  %1814 = vrot.lane.b32.xlu0 %v3443_v16, %s2633_s11 }
0x1540   :  { %1810 = vrot.lane.b32.xlu1 %v1808_v55, %s2634_s12 }
0x15b0   :  { %v1815_v13 = vpop.permute.xlu0 %1814 }
0x15b2   :  { %v1811_v14 = vpop.permute.xlu1 %1810 }
0x15b3   :  { %v1817_v15 = vsel %vm71_vm1, %v1811_v14, %v1815_v13 }
0x15b4   :  { %2459 = vmatmul.mubr.msk.f32.vlgmr.msra.gmra.mxu1 %vm305_vm4, %v1817_v15 }
0x1674   :  { %v1887_v17 = vpop.f32.mrf.mxu1 }
0x1675   :  { %v1888_v18 = vadd.f32 %v2629_v61, %v1887_v17  ;;  %v1932_v61 = vld [vmem:[%s3509_s7 + $0x8] sm:$0xff] }
0x1676   :  { %v2460_v19 = vpop.f32.mrf.mxu1 }
0x1677   :  { %2607 = vtanh.f32 %v1888_v18  ;;  %v2065_v46 = vmul.f32 -1.442695, %v1888_v18 }
0x1679   :  { %2609 = vpow2.f32 %v2065_v46 }
0x1684   :  { %v2608_v20 = vpop.eup %2607 }
0x1685   :  { %1900 = vrot.lane.b32.xlu1 %v2608_v20, %s2633_s11 }
0x1686   :  { %v2610_v54 = vpop.eup %2609 }
0x1687   :  { %v1894_v21 = vadd.f32 1.0, %v2610_v54 }
0x1689   :  { %1917 = vperm.xlu1 %2485, %v1915_v53   ;;  %2611 = vrcp.f32 %v1894_v21 }
0x1696   :  { %v2612_v56 = vpop.eup %2611 }
0x1697   :  { %v1898_v26 = vmul.f32 %v2612_v56, %v1707_v11 }
0x16f7   :  { %v1901_v22 = vpop.permute.xlu1 %1900 }
0x16f8   :  { %v1903_v23 = vmul.f32 %v2612_v56, %v1901_v22 }
0x16fa   :  { %1905 = vrot.lane.b32.xlu0 %v1903_v23, %s2634_s12 }
0x1704   :  { %v1918_v37 = vpop.permute.xlu1 %1917 }
0x1705   :  { %vm1919_vm3 = vcmp.eq.s32.totalorder %v1918_v37, 1 }
0x1706   :  { %v1920_v6 = vsel %vm1919_vm3, %v1808_v55, %v3389_v24  ;;  %v1935_v24 = vld [vmem:[%s3509_s7 + $0x20] sm:$0xff] }
0x1707   :  { %1923 = vrot.lane.b32.xlu1 %v1920_v6, %s2634_s12  ;;  %2468 = vmatpush3.msra.mxu0 %v1935_v24 }
0x1708   :  { %2469 = vmatprep.subr.mxu0 %v2630_v2 }
0x1709   :  { %2470 = vmatpush3.msra.mxu0 %v1934_v28 }
0x170a   :  { %2471 = vmatprep.subr.mxu0 %v2630_v2 }
0x170b   :  { %2472 = vmatpush3.msra.mxu0 %v1933_v27 }
0x170c   :  { %2473 = vmatprep.subr.mxu0 %v2630_v2 }
0x170d   :  { %2474 = vmatpush3.msra.mxu0 %v1932_v61 }
0x170e   :  { %2475 = vmatprep.subr.mxu0 %v2630_v2  ;;  %v2066_v2 = vld [vmem:[%s3510_s8] ss:$0 sm:$0xff] }
0x170f   :  { %2476 = vmatpush3.msra.mxu0 %v1931_v39 }
0x176c   :  { %v1906_v31 = vpop.permute.xlu0 %1905 }
0x176d   :  { %v1908_v41 = vadd.f32 %v1906_v31, %v1898_v26 }
0x176f   :  { %2613 = vtanh.f32 %v1908_v41 }
0x1779   :  { %v1924_v29 = vpop.permute.xlu1 %1923 }
0x177c   :  { %v2614_v50 = vpop.eup %2613 }
0x177d   :  { %1911 = vrot.lane.b32.xlu0 %v2614_v50, %s2633_s11 }
0x17ef   :  { %v1912_v48 = vpop.permute.xlu0 %1911 }
0x17f0   :  { %v1914_v32 = vmul.f32 %v2612_v56, %v1912_v48 }
0x17f2   :  { %v1921_v47 = vsel %vm1919_vm3, %v1914_v32, %v3443_v16 }
0x17f3   :  { %1927 = vrot.lane.b32.xlu0 %v1921_v47, %s2633_s11 }
0x1865   :  { %v1928_v35 = vpop.permute.xlu0 %1927 }
0x1866   :  { %v1930_v63 = vsel %vm71_vm1, %v1924_v29, %v1928_v35 }
0x1867   :  { %2478 = vmatmul.mubr.msk.f32.vlgmr.msra.gmra.mxu0 %vm305_vm4, %v1930_v63 }
0x1927   :  { %v2015_v0 = vpop.f32.mrf.mxu0 }
0x1928   :  { %v2016_v51 = vadd.f32 %v2066_v2, %v2015_v0 }
0x1929   :  { %v2479_v60 = vpop.f32.mrf.mxu0 }
0x192a   :  { %2020 = vst.msk [vmem:[%s3511_s9] sm:$0xff] %vm2019_vm5, %v2016_v51 }

</bundles_post_ra>
